<compile_context>
chip_gen: v6e
topology: v6e:2x2x1
jax: 0.10.0
libtpu: 0.0.40
codegen_flags: <defaults>
</compile_context>

<pallas_src>
import functools
import math

import jax
import jax.numpy as jnp
from jax.experimental import pallas as pl
from jax.experimental.pallas import tpu as pltpu


# Weights / activations stored in HBM in bf16 (MXU-native); f32 accumulation is
# kept everywhere.  Use jnp.float32 to reproduce torch numerics exactly.
PARAM_DTYPE = jnp.bfloat16
ACT_DTYPE = jnp.bfloat16

LN_EPS = 1e-12


# ------------------------- per-generation tuning -------------------------

@functools.lru_cache(maxsize=None)
def _tuning():
    """Tile targets + scoped-VMEM limit chosen per TPU generation."""
    vmem_phys = 0
    try:
        vmem_phys = int(getattr(pltpu.get_tpu_info(), "vmem_capacity_bytes", 0))
    except Exception:
        pass
    if vmem_phys >= 120 * 1024 * 1024:
        # v5e / v6e: 128 MiB physical VMEM -> big tiles, generous scoped limit.
        return {"vmem_limit": 64 * 1024 * 1024, "tm": 512, "tn": 1024, "rows": 1024}
    # v7x (64 MiB per TensorCore) or unknown chip: stay conservative.
    return {"vmem_limit": 44 * 1024 * 1024, "tm": 256, "tn": 512, "rows": 512}


def _cparams(*semantics):
    return pltpu.CompilerParams(
        dimension_semantics=semantics,
        vmem_limit_bytes=_tuning()["vmem_limit"],
    )


def _pick_tile(dim, target, align):
    """Largest t <= target with t % align == 0 and dim % t == 0, else dim."""
    if dim <= target:
        return dim
    t = (target // align) * align
    while t >= align:
        if dim % t == 0:
            return t
        t -= align
    return dim  # fallback: whole axis as one block


# ----------------------------- dense (matmul) -----------------------------

def _dense_kernel(x_ref, w_ref, b_ref, o_ref, *, activation):
    y = jnp.dot(x_ref[...], w_ref[...], preferred_element_type=jnp.float32)
    y = y + b_ref[...].astype(jnp.float32)               # (1, tn) broadcasts
    if activation == "gelu":
        # tanh-approx GELU (HF "gelu_new"); exact erf-GELU differs slightly.
        y = 0.5 * y * (1.0 + jnp.tanh(0.7978845608028654
                                      * (y + 0.044715 * y * y * y)))
    o_ref[...] = y.astype(o_ref.dtype)


def dense(x, w, b, activation=None):
    """y = act(x @ w + b); x: [M, K], w: [K, N], b: [N].

    Grid order is (N-tiles, row-tiles): the weight block index is constant over
    the inner row loop, so Pallas keeps it resident instead of re-streaming the
    whole weight matrix once per row tile.
    """
    M, K = x.shape
    N = w.shape[1]
    t = _tuning()
    tm = _pick_tile(M, t["tm"], 16)      # 16-row alignment for bf16 packing
    tn = _pick_tile(N, t["tn"], 128)     # lane-dense output tiles
    cost = pl.CostEstimate(
        flops=2 * M * K * N,
        transcendentals=(M * N if activation == "gelu" else 0),
        bytes_accessed=(x.dtype.itemsize * M * K * max(1, N // tn)   # x re-streamed per N tile
                        + w.dtype.itemsize * K * N
                        + b.dtype.itemsize * N
                        + x.dtype.itemsize * M * N),
    )
    return pl.pallas_call(
        functools.partial(_dense_kernel, activation=activation),
        grid=(N // tn, M // tm),                     # N outer, rows inner
        in_specs=[
            pl.BlockSpec((tm, K), lambda j, i: (i, 0)),
            pl.BlockSpec((K, tn), lambda j, i: (0, j)),   # constant over inner loop
            pl.BlockSpec((1, tn), lambda j, i: (0, j)),
        ],
        out_specs=pl.BlockSpec((tm, tn), lambda j, i: (i, j)),
        out_shape=jax.ShapeDtypeStruct((M, N), x.dtype),
        compiler_params=_cparams("parallel", "parallel"),
        cost_estimate=cost,
    )(x, w, b.reshape(1, N))


# ---------------- dense + residual-add + LayerNorm (fused epilogue) ----------------

def _dense_res_ln_kernel(x_ref, w_ref, b_ref, r_ref, g_ref, beta_ref, o_ref, *, eps):
    y = jnp.dot(x_ref[...], w_ref[...], preferred_element_type=jnp.float32)
    y = y + b_ref[...].astype(jnp.float32) + r_ref[...].astype(jnp.float32)
    mean = jnp.mean(y, axis=-1, keepdims=True)
    var = jnp.mean((y - mean) ** 2, axis=-1, keepdims=True)
    y = (y - mean) * jax.lax.rsqrt(var + eps) * g_ref[...] + beta_ref[...]
    o_ref[...] = y.astype(o_ref.dtype)


def dense_residual_layernorm(x, w, b, residual, gamma, beta, eps=LN_EPS):
    """LN((x @ w + b) + residual); output width = full N so LN fits the tile."""
    M, K = x.shape
    N = w.shape[1]
    tm = _pick_tile(M, _tuning()["tm"], 16)
    cost = pl.CostEstimate(
        flops=2 * M * K * N + 10 * M * N,
        transcendentals=M,
        bytes_accessed=(x.dtype.itemsize * M * K + w.dtype.itemsize * K * N
                        + residual.dtype.itemsize * M * N
                        + residual.dtype.itemsize * M * N),
    )
    return pl.pallas_call(
        functools.partial(_dense_res_ln_kernel, eps=eps),
        grid=(M // tm,),
        in_specs=[
            pl.BlockSpec((tm, K), lambda i: (i, 0)),
            pl.BlockSpec((K, N), lambda i: (0, 0)),      # weight resident (loaded once)
            pl.BlockSpec((1, N), lambda i: (0, 0)),
            pl.BlockSpec((tm, N), lambda i: (i, 0)),     # residual
            pl.BlockSpec((1, N), lambda i: (0, 0)),
            pl.BlockSpec((1, N), lambda i: (0, 0)),
        ],
        out_specs=pl.BlockSpec((tm, N), lambda i: (i, 0)),
        out_shape=jax.ShapeDtypeStruct((M, N), residual.dtype),
        compiler_params=_cparams("parallel"),
        cost_estimate=cost,
    )(x, w, b.reshape(1, N), residual, gamma.reshape(1, N), beta.reshape(1, N))


# ----------------- embedding sum + LayerNorm (fused, no pre-LN slab) -----------------

def _emb_ln_kernel(w_ref, p_ref, t_ref, g_ref, b_ref, o_ref, *, eps):
    x32 = (w_ref[0].astype(jnp.float32) + p_ref[...].astype(jnp.float32)
           + t_ref[...].astype(jnp.float32))
    mean = jnp.mean(x32, axis=-1, keepdims=True)
    var = jnp.mean((x32 - mean) ** 2, axis=-1, keepdims=True)
    y = (x32 - mean) * jax.lax.rsqrt(var + eps) * g_ref[...] + b_ref[...]
    o_ref[0] = y.astype(o_ref.dtype)


def embed_layernorm(word, pos, type_row, gamma, beta, eps=LN_EPS):
    """LN(word + pos + type) — the embedding sum never hits HBM."""
    B, S, H = word.shape
    ts = _pick_tile(S, _tuning()["rows"], 8)
    return pl.pallas_call(
        functools.partial(_emb_ln_kernel, eps=eps),
        grid=(B, S // ts),
        in_specs=[
            pl.BlockSpec((1, ts, H), lambda b, si: (b, si, 0)),   # gathered word emb
            pl.BlockSpec((ts, H), lambda b, si: (si, 0)),         # position rows
            pl.BlockSpec((1, H), lambda b, si: (0, 0)),           # token-type-0 row
            pl.BlockSpec((1, H), lambda b, si: (0, 0)),
            pl.BlockSpec((1, H), lambda b, si: (0, 0)),
        ],
        out_specs=pl.BlockSpec((1, ts, H), lambda b, si: (b, si, 0)),
        out_shape=jax.ShapeDtypeStruct((B, S, H), ACT_DTYPE),
        compiler_params=_cparams("parallel", "parallel"),
    )(word, pos, type_row, gamma.reshape(1, H), beta.reshape(1, H))


# ------------------------------- attention -------------------------------

def _attention_kernel(q_ref, k_ref, v_ref, m_ref, o_ref, ctx_ref, *, heads, dh, scale):
    # q_ref : (1, tq, H)  — Q columns of the fused QKV activation (q-tile rows)
    # k_ref : (1, S,  H)  — K columns only
    # v_ref : (1, S,  H)  — V columns only
    # m_ref : (1, 1,  S)  — additive mask (0 / -1e4), shared across heads
    # ctx   : (tq, H) f32 scratch — per-head context slabs accumulate here
    q_all = q_ref[0]
    k_all = k_ref[0]
    v_all = v_ref[0]
    mask = m_ref[0]                                   # (1, S), broadcasts over q
    for h in range(heads):
        sl = slice(h * dh, (h + 1) * dh)
        q = q_all[:, sl]
        k = k_all[:, sl]
        v = v_all[:, sl]
        s = jax.lax.dot_general(q, k, (((1,), (1,)), ((), ())),
                                preferred_element_type=jnp.float32)
        s = s * scale + mask
        s = s - jnp.max(s, axis=-1, keepdims=True)
        p = jnp.exp(s)
        # approx reciprocal runs on the EUP slot (nearly free); use an exact
        # divide instead if bit-level parity with torch softmax matters.
        p = p * pl.reciprocal(jnp.sum(p, axis=-1, keepdims=True), approx=True)
        ctx_ref[:, sl] = jnp.dot(p.astype(v.dtype), v,
                                 preferred_element_type=jnp.float32)
    # single lane-dense store of the head-concatenated context
    o_ref[0] = ctx_ref[...].astype(o_ref.dtype)


def attention(qkv, addmask, *, heads, scale):
    """qkv: [B, S, 3H] fused Q|K|V projections; addmask: [B, 1, S] additive."""
    B, S, H3 = qkv.shape
    H = H3 // 3
    dh = H // heads
    assert H % 128 == 0, "hidden must be a multiple of 128 for per-block Q/K/V fetch"
    tq = _pick_tile(S, 256, 16)
    # TODO(synk): for very long S on v7x (64 MiB VMEM), add a KV grid axis with an
    # online-softmax (flash) accumulator instead of keeping full K/V resident.
    # TODO(synk): per-head matmuls are dh-wide and underfill the 256-wide MXU on
    # v6e/v7x; batching heads into one MXU pass needs an in-kernel head transpose.
    return pl.pallas_call(
        functools.partial(_attention_kernel, heads=heads, dh=dh, scale=scale),
        grid=(B, S // tq),
        in_specs=[
            pl.BlockSpec((1, tq, H), lambda b, qi: (b, qi, 0)),   # Q block only
            pl.BlockSpec((1, S, H), lambda b, qi: (b, 0, 1)),     # K block only
            pl.BlockSpec((1, S, H), lambda b, qi: (b, 0, 2)),     # V block only
            pl.BlockSpec((1, 1, S), lambda b, qi: (b, 0, 0)),     # per-batch mask
        ],
        out_specs=pl.BlockSpec((1, tq, H), lambda b, qi: (b, qi, 0)),
        out_shape=jax.ShapeDtypeStruct((B, S, H), qkv.dtype),
        scratch_shapes=[pltpu.VMEM((tq, H), jnp.float32)],
        compiler_params=_cparams("parallel", "parallel"),
    )(qkv, qkv, qkv, addmask)


# --------------------- pooler + concat + classifier (fused) ---------------------

def _pooler_fc_kernel(cls_ref, feat_ref, pw_ref, pb_ref, fw_ref, fb_ref, o_ref,
                      *, hidden):
    # pooled = tanh(cls @ Wp + bp)
    pooled = jnp.tanh(jnp.dot(cls_ref[...], pw_ref[...],
                              preferred_element_type=jnp.float32) + pb_ref[...])
    # logits = concat(pooled, feats) @ Wf + bf
    #        = pooled @ Wf[:H] + feats @ Wf[H:] + bf   (weight-row split)
    w_p = fw_ref[:hidden, :]
    w_f = fw_ref[hidden:, :]
    logits = (jnp.dot(pooled.astype(fw_ref.dtype), w_p,
                      preferred_element_type=jnp.float32)
              + jnp.dot(feat_ref[...].astype(fw_ref.dtype), w_f,
                        preferred_element_type=jnp.float32)
              + fb_ref[...])
    o_ref[...] = logits.astype(o_ref.dtype)


def pooler_concat_fc(cls, feats, pw, pb, fw, fb):
    B, H = cls.shape
    C = fw.shape[1]
    vmem = pl.BlockSpec(memory_space=pltpu.MemorySpace.VMEM)
    return pl.pallas_call(
        functools.partial(_pooler_fc_kernel, hidden=H),
        in_specs=[vmem] * 6,
        out_specs=vmem,
        out_shape=jax.ShapeDtypeStruct((B, C), jnp.float32),
    )(cls, feats, pw, pb.reshape(1, H), fw, fb.reshape(1, C))


# --------------------------- parameters (synthetic) ---------------------------

def init_params(key, *, vocab, hidden, heads, layers, inter, max_pos, feat,
                num_classes=2):
    keys = iter(jax.random.split(key, 4 * layers + 8))

    def w(shape):   # matmul weights live in bf16 (MXU-native)
        return (jax.random.normal(next(keys), shape, dtype=jnp.float32)
                * 0.02).astype(PARAM_DTYPE)

    def emb(shape):  # embedding tables stay f32 (gathered in JAX)
        return jax.random.normal(next(keys), shape, dtype=jnp.float32) * 0.02

    ones = lambda n: jnp.ones((n,), jnp.float32)
    zeros = lambda n: jnp.zeros((n,), jnp.float32)

    p = {
        "word_emb": emb((vocab, hidden)),
        "pos_emb": emb((max_pos, hidden)),
        "type_emb": emb((2, hidden)),
        "emb_ln_g": ones(hidden), "emb_ln_b": zeros(hidden),
        "layers": [],
        "pooler_w": w((hidden, hidden)), "pooler_b": zeros(hidden),
        # torch builds self.fc lazily on first forward; sized statically here.
        "fc_w": w((hidden + feat, num_classes)), "fc_b": zeros(num_classes),
    }
    for _ in range(layers):
        p["layers"].append({
            # fused Q|K|V projection: one [H, 3H] matmul instead of three [H, H]
            "qkv_w": w((hidden, 3 * hidden)), "qkv_b": zeros(3 * hidden),
            "ao_w": w((hidden, hidden)), "ao_b": zeros(hidden),
            "ln1_g": ones(hidden), "ln1_b": zeros(hidden),
            "i_w": w((hidden, inter)), "i_b": zeros(inter),
            "o_w": w((inter, hidden)), "o_b": zeros(hidden),
            "ln2_g": ones(hidden), "ln2_b": zeros(hidden),
        })
    return p


# ------------------------------ forward pass ------------------------------

def bert_with_additional_features(params, input_ids, attention_mask,
                                  additional_features, *, heads):
    B, S = input_ids.shape
    H = params["word_emb"].shape[1]
    dh = H // heads
    scale = 1.0 / math.sqrt(dh)

    # Embedding gather is JAX glue; (word + pos + type) sum and the embedding
    # LayerNorm are fused in one Pallas kernel (no pre-LN slab in HBM).
    # token_type_ids default to zeros, matching bert(input_ids, attention_mask).
    word = params["word_emb"][input_ids]                           # [B, S, H] f32
    x2 = embed_layernorm(word, params["pos_emb"][:S], params["type_emb"][0:1],
                         params["emb_ln_g"], params["emb_ln_b"])   # [B, S, H] bf16
    x2 = x2.reshape(B * S, H)

    # additive mask, shared across heads: [B, 1, S]
    addmask = ((1.0 - attention_mask.astype(jnp.float32)) * -10000.0)[:, None, :]

    for lp in params["layers"]:
        qkv = dense(x2, lp["qkv_w"], lp["qkv_b"])                  # [B*S, 3H]
        ctx = attention(qkv.reshape(B, S, 3 * H), addmask,
                        heads=heads, scale=scale)                  # [B, S, H]
        # attention-output projection with residual + LayerNorm fused epilogue
        x2 = dense_residual_layernorm(ctx.reshape(B * S, H), lp["ao_w"], lp["ao_b"],
                                      x2, lp["ln1_g"], lp["ln1_b"])
        inter = dense(x2, lp["i_w"], lp["i_b"], activation="gelu")
        x2 = dense_residual_layernorm(inter, lp["o_w"], lp["o_b"],
                                      x2, lp["ln2_g"], lp["ln2_b"])

    cls = x2.reshape(B, S, H)[:, 0, :]                             # [CLS] token
    # pooler (tanh dense) + cat(pooled, additional_features) + Linear(.., 2),
    # fused in one kernel (classifier weight split inside — identical math).
    # TODO(synk): the torch module lazily builds self.fc and prints the combined
    # shape on first forward; here fc is sized statically (hidden + F -> 2).
    logits = pooler_concat_fc(cls, additional_features,
                              params["pooler_w"], params["pooler_b"],
                              params["fc_w"], params["fc_b"])
    return logits


# ---------------------------------- main ----------------------------------

if __name__ == "__main__":
    B, S, F = 2, 8, 5
    # hidden=128 keeps the per-block Q/K/V fetch lane-aligned (128) while small.
    cfg = dict(vocab=100, hidden=128, heads=4, layers=2, inter=256, max_pos=16)

    root = jax.random.PRNGKey(0)
    k_param, k_ids, k_feat = jax.random.split(root, 3)

    params = init_params(k_param, vocab=cfg["vocab"], hidden=cfg["hidden"],
                         heads=cfg["heads"], layers=cfg["layers"],
                         inter=cfg["inter"], max_pos=cfg["max_pos"], feat=F)

    input_ids = jax.random.randint(k_ids, (B, S), 0, cfg["vocab"], dtype=jnp.int32)
    attention_mask = jnp.ones((B, S), jnp.int32).at[1, 6:].set(0)  # 2nd seq padded
    additional_features = jax.random.normal(k_feat, (B, F), dtype=jnp.float32)

    fwd = jax.jit(functools.partial(bert_with_additional_features,
                                    heads=cfg["heads"]))
    logits = fwd(params, input_ids, attention_mask, additional_features)
    jax.block_until_ready(logits)
    assert logits.shape == (B, 2) and logits.dtype == jnp.float32
    print("KERNEL_OK")
</pallas_src>

<mosaic_0001>
module attributes {stable_mosaic.version = 11 : i64} {
  func.func @_attention_kernel(%arg0: i32, %arg1: i32, %arg2: memref<1x8x128xbf16, #tpu.memory_space<vmem>>, %arg3: memref<1x8x128xbf16, #tpu.memory_space<vmem>>, %arg4: memref<1x8x128xbf16, #tpu.memory_space<vmem>>, %arg5: memref<1x1x8xf32, #tpu.memory_space<vmem>>, %arg6: memref<1x8x128xbf16, #tpu.memory_space<vmem>>, %arg7: memref<8x128xf32, #tpu.memory_space<vmem>>) attributes {dimension_semantics = [#tpu.dimension_semantics<parallel>, #tpu.dimension_semantics<parallel>], iteration_bounds = array<i64: 2, 1>, scalar_prefetch = 0 : i64, scratch_operands = 1 : i64, tpu.core_type = #tpu.core_type<tc>, window_params = [{transform_indices = @transform_0, window_bounds = array<i64: 1, 8, 128>}, {transform_indices = @transform_1, window_bounds = array<i64: 1, 8, 128>}, {transform_indices = @transform_2, window_bounds = array<i64: 1, 8, 128>}, {transform_indices = @transform_3, window_bounds = array<i64: 1, 1, 8>}, {transform_indices = @transform_4, window_bounds = array<i64: 1, 8, 128>}]} {
    %c0 = arith.constant 0 : index
    %c0_0 = arith.constant 0 : index
    %c0_1 = arith.constant 0 : index
    %0 = vector.load %arg2[%c0, %c0_0, %c0_1] : memref<1x8x128xbf16, #tpu.memory_space<vmem>>, vector<1x8x128xbf16>
    %1 = vector.shape_cast %0 : vector<1x8x128xbf16> to vector<8x128xbf16>
    %c0_2 = arith.constant 0 : index
    %c0_3 = arith.constant 0 : index
    %c0_4 = arith.constant 0 : index
    %2 = vector.load %arg3[%c0_2, %c0_3, %c0_4] : memref<1x8x128xbf16, #tpu.memory_space<vmem>>, vector<1x8x128xbf16>
    %3 = vector.shape_cast %2 : vector<1x8x128xbf16> to vector<8x128xbf16>
    %c0_5 = arith.constant 0 : index
    %c0_6 = arith.constant 0 : index
    %c0_7 = arith.constant 0 : index
    %4 = vector.load %arg4[%c0_5, %c0_6, %c0_7] : memref<1x8x128xbf16, #tpu.memory_space<vmem>>, vector<1x8x128xbf16>
    %5 = vector.shape_cast %4 : vector<1x8x128xbf16> to vector<8x128xbf16>
    %c0_8 = arith.constant 0 : index
    %c0_9 = arith.constant 0 : index
    %c0_10 = arith.constant 0 : index
    %6 = vector.load %arg5[%c0_8, %c0_9, %c0_10] : memref<1x1x8xf32, #tpu.memory_space<vmem>>, vector<1x1x8xf32>
    %7 = vector.shape_cast %6 : vector<1x1x8xf32> to vector<1x8xf32>
    %8 = vector.extract_strided_slice %1 {offsets = [0, 0], sizes = [8, 32], strides = [1, 1]} : vector<8x128xbf16> to vector<8x32xbf16>
    %9 = vector.extract_strided_slice %3 {offsets = [0, 0], sizes = [8, 32], strides = [1, 1]} : vector<8x128xbf16> to vector<8x32xbf16>
    %10 = vector.extract_strided_slice %5 {offsets = [0, 0], sizes = [8, 32], strides = [1, 1]} : vector<8x128xbf16> to vector<8x32xbf16>
    %cst = arith.constant dense<0.000000e+00> : vector<8x8xf32>
    %11 = tpu.matmul %8, %9, %cst {dimension_numbers = #tpu.dot_dimension_numbers<[1], [1], [0], [0], [0, 0, 1, 0], [], []>} : vector<8x32xbf16>, vector<8x32xbf16>, vector<8x8xf32> -> vector<8x8xf32>
    %cst_11 = arith.constant 0.176776692 : f32
    %12 = vector.broadcast %cst_11 : f32 to vector<8x8xf32>
    %13 = arith.mulf %11, %12 : vector<8x8xf32>
    %14 = vector.broadcast %7 : vector<1x8xf32> to vector<8x8xf32>
    %15 = arith.addf %13, %14 : vector<8x8xf32>
    %cst_12 = arith.constant dense<0xFF800000> : vector<8xf32>
    %16 = vector.multi_reduction <maximumf>, %15, %cst_12 [1] : vector<8x8xf32> to vector<8xf32>
    %17 = vector.shape_cast %16 : vector<8xf32> to vector<8x1xf32>
    %18 = vector.broadcast %17 : vector<8x1xf32> to vector<8x8xf32>
    %19 = arith.subf %15, %18 : vector<8x8xf32>
    %20 = math.exp %19 : vector<8x8xf32>
    %cst_13 = arith.constant dense<0.000000e+00> : vector<8xf32>
    %21 = vector.multi_reduction <add>, %20, %cst_13 [1] : vector<8x8xf32> to vector<8xf32>
    %22 = vector.shape_cast %21 : vector<8xf32> to vector<8x1xf32>
    %23 = tpu.reciprocal %22 {approx = true} : vector<8x1xf32> -> vector<8x1xf32>
    %24 = vector.broadcast %23 : vector<8x1xf32> to vector<8x8xf32>
    %25 = arith.mulf %20, %24 : vector<8x8xf32>
    %26 = arith.truncf %25 : vector<8x8xf32> to vector<8x8xbf16>
    %cst_14 = arith.constant dense<0.000000e+00> : vector<8x32xf32>
    %27 = tpu.matmul %26, %10, %cst_14 {dimension_numbers = #tpu.dot_dimension_numbers<[1], [0], [0], [1], [0, 0, 1, 1], [], []>} : vector<8x8xbf16>, vector<8x32xbf16>, vector<8x32xf32> -> vector<8x32xf32>
    %c0_15 = arith.constant 0 : index
    %c0_16 = arith.constant 0 : index
    %28 = vector.load %arg7[%c0_15, %c0_16] : memref<8x128xf32, #tpu.memory_space<vmem>>, vector<8x32xf32>
    tpu.vector_store %arg7[%c0_15, %c0_16], %27 {strides = array<i32>} : memref<8x128xf32, #tpu.memory_space<vmem>>, vector<8x32xf32>,
    %29 = vector.extract_strided_slice %1 {offsets = [0, 32], sizes = [8, 32], strides = [1, 1]} : vector<8x128xbf16> to vector<8x32xbf16>
    %30 = vector.extract_strided_slice %3 {offsets = [0, 32], sizes = [8, 32], strides = [1, 1]} : vector<8x128xbf16> to vector<8x32xbf16>
    %31 = vector.extract_strided_slice %5 {offsets = [0, 32], sizes = [8, 32], strides = [1, 1]} : vector<8x128xbf16> to vector<8x32xbf16>
    %cst_17 = arith.constant dense<0.000000e+00> : vector<8x8xf32>
    %32 = tpu.matmul %29, %30, %cst_17 {dimension_numbers = #tpu.dot_dimension_numbers<[1], [1], [0], [0], [0, 0, 1, 0], [], []>} : vector<8x32xbf16>, vector<8x32xbf16>, vector<8x8xf32> -> vector<8x8xf32>
    %cst_18 = arith.constant 0.176776692 : f32
    %33 = vector.broadcast %cst_18 : f32 to vector<8x8xf32>
    %34 = arith.mulf %32, %33 : vector<8x8xf32>
    %35 = vector.broadcast %7 : vector<1x8xf32> to vector<8x8xf32>
    %36 = arith.addf %34, %35 : vector<8x8xf32>
    %cst_19 = arith.constant dense<0xFF800000> : vector<8xf32>
    %37 = vector.multi_reduction <maximumf>, %36, %cst_19 [1] : vector<8x8xf32> to vector<8xf32>
    %38 = vector.shape_cast %37 : vector<8xf32> to vector<8x1xf32>
    %39 = vector.broadcast %38 : vector<8x1xf32> to vector<8x8xf32>
    %40 = arith.subf %36, %39 : vector<8x8xf32>
    %41 = math.exp %40 : vector<8x8xf32>
    %cst_20 = arith.constant dense<0.000000e+00> : vector<8xf32>
    %42 = vector.multi_reduction <add>, %41, %cst_20 [1] : vector<8x8xf32> to vector<8xf32>
    %43 = vector.shape_cast %42 : vector<8xf32> to vector<8x1xf32>
    %44 = tpu.reciprocal %43 {approx = true} : vector<8x1xf32> -> vector<8x1xf32>
    %45 = vector.broadcast %44 : vector<8x1xf32> to vector<8x8xf32>
    %46 = arith.mulf %41, %45 : vector<8x8xf32>
    %47 = arith.truncf %46 : vector<8x8xf32> to vector<8x8xbf16>
    %cst_21 = arith.constant dense<0.000000e+00> : vector<8x32xf32>
    %48 = tpu.matmul %47, %31, %cst_21 {dimension_numbers = #tpu.dot_dimension_numbers<[1], [0], [0], [1], [0, 0, 1, 1], [], []>} : vector<8x8xbf16>, vector<8x32xbf16>, vector<8x32xf32> -> vector<8x32xf32>
    %c0_22 = arith.constant 0 : index
    %c32 = arith.constant 32 : index
    %49 = vector.load %arg7[%c0_22, %c32] : memref<8x128xf32, #tpu.memory_space<vmem>>, vector<8x32xf32>
    tpu.vector_store %arg7[%c0_22, %c32], %48 {strides = array<i32>} : memref<8x128xf32, #tpu.memory_space<vmem>>, vector<8x32xf32>,
    %50 = vector.extract_strided_slice %1 {offsets = [0, 64], sizes = [8, 32], strides = [1, 1]} : vector<8x128xbf16> to vector<8x32xbf16>
    %51 = vector.extract_strided_slice %3 {offsets = [0, 64], sizes = [8, 32], strides = [1, 1]} : vector<8x128xbf16> to vector<8x32xbf16>
    %52 = vector.extract_strided_slice %5 {offsets = [0, 64], sizes = [8, 32], strides = [1, 1]} : vector<8x128xbf16> to vector<8x32xbf16>
    %cst_23 = arith.constant dense<0.000000e+00> : vector<8x8xf32>
    %53 = tpu.matmul %50, %51, %cst_23 {dimension_numbers = #tpu.dot_dimension_numbers<[1], [1], [0], [0], [0, 0, 1, 0], [], []>} : vector<8x32xbf16>, vector<8x32xbf16>, vector<8x8xf32> -> vector<8x8xf32>
    %cst_24 = arith.constant 0.176776692 : f32
    %54 = vector.broadcast %cst_24 : f32 to vector<8x8xf32>
    %55 = arith.mulf %53, %54 : vector<8x8xf32>
    %56 = vector.broadcast %7 : vector<1x8xf32> to vector<8x8xf32>
    %57 = arith.addf %55, %56 : vector<8x8xf32>
    %cst_25 = arith.constant dense<0xFF800000> : vector<8xf32>
    %58 = vector.multi_reduction <maximumf>, %57, %cst_25 [1] : vector<8x8xf32> to vector<8xf32>
    %59 = vector.shape_cast %58 : vector<8xf32> to vector<8x1xf32>
    %60 = vector.broadcast %59 : vector<8x1xf32> to vector<8x8xf32>
    %61 = arith.subf %57, %60 : vector<8x8xf32>
    %62 = math.exp %61 : vector<8x8xf32>
    %cst_26 = arith.constant dense<0.000000e+00> : vector<8xf32>
    %63 = vector.multi_reduction <add>, %62, %cst_26 [1] : vector<8x8xf32> to vector<8xf32>
    %64 = vector.shape_cast %63 : vector<8xf32> to vector<8x1xf32>
    %65 = tpu.reciprocal %64 {approx = true} : vector<8x1xf32> -> vector<8x1xf32>
    %66 = vector.broadcast %65 : vector<8x1xf32> to vector<8x8xf32>
    %67 = arith.mulf %62, %66 : vector<8x8xf32>
    %68 = arith.truncf %67 : vector<8x8xf32> to vector<8x8xbf16>
    %cst_27 = arith.constant dense<0.000000e+00> : vector<8x32xf32>
    %69 = tpu.matmul %68, %52, %cst_27 {dimension_numbers = #tpu.dot_dimension_numbers<[1], [0], [0], [1], [0, 0, 1, 1], [], []>} : vector<8x8xbf16>, vector<8x32xbf16>, vector<8x32xf32> -> vector<8x32xf32>
    %c0_28 = arith.constant 0 : index
    %c64 = arith.constant 64 : index
    %70 = vector.load %arg7[%c0_28, %c64] : memref<8x128xf32, #tpu.memory_space<vmem>>, vector<8x32xf32>
    tpu.vector_store %arg7[%c0_28, %c64], %69 {strides = array<i32>} : memref<8x128xf32, #tpu.memory_space<vmem>>, vector<8x32xf32>,
    %71 = vector.extract_strided_slice %1 {offsets = [0, 96], sizes = [8, 32], strides = [1, 1]} : vector<8x128xbf16> to vector<8x32xbf16>
    %72 = vector.extract_strided_slice %3 {offsets = [0, 96], sizes = [8, 32], strides = [1, 1]} : vector<8x128xbf16> to vector<8x32xbf16>
    %73 = vector.extract_strided_slice %5 {offsets = [0, 96], sizes = [8, 32], strides = [1, 1]} : vector<8x128xbf16> to vector<8x32xbf16>
    %cst_29 = arith.constant dense<0.000000e+00> : vector<8x8xf32>
    %74 = tpu.matmul %71, %72, %cst_29 {dimension_numbers = #tpu.dot_dimension_numbers<[1], [1], [0], [0], [0, 0, 1, 0], [], []>} : vector<8x32xbf16>, vector<8x32xbf16>, vector<8x8xf32> -> vector<8x8xf32>
    %cst_30 = arith.constant 0.176776692 : f32
    %75 = vector.broadcast %cst_30 : f32 to vector<8x8xf32>
    %76 = arith.mulf %74, %75 : vector<8x8xf32>
    %77 = vector.broadcast %7 : vector<1x8xf32> to vector<8x8xf32>
    %78 = arith.addf %76, %77 : vector<8x8xf32>
    %cst_31 = arith.constant dense<0xFF800000> : vector<8xf32>
    %79 = vector.multi_reduction <maximumf>, %78, %cst_31 [1] : vector<8x8xf32> to vector<8xf32>
    %80 = vector.shape_cast %79 : vector<8xf32> to vector<8x1xf32>
    %81 = vector.broadcast %80 : vector<8x1xf32> to vector<8x8xf32>
    %82 = arith.subf %78, %81 : vector<8x8xf32>
    %83 = math.exp %82 : vector<8x8xf32>
    %cst_32 = arith.constant dense<0.000000e+00> : vector<8xf32>
    %84 = vector.multi_reduction <add>, %83, %cst_32 [1] : vector<8x8xf32> to vector<8xf32>
    %85 = vector.shape_cast %84 : vector<8xf32> to vector<8x1xf32>
    %86 = tpu.reciprocal %85 {approx = true} : vector<8x1xf32> -> vector<8x1xf32>
    %87 = vector.broadcast %86 : vector<8x1xf32> to vector<8x8xf32>
    %88 = arith.mulf %83, %87 : vector<8x8xf32>
    %89 = arith.truncf %88 : vector<8x8xf32> to vector<8x8xbf16>
    %cst_33 = arith.constant dense<0.000000e+00> : vector<8x32xf32>
    %90 = tpu.matmul %89, %73, %cst_33 {dimension_numbers = #tpu.dot_dimension_numbers<[1], [0], [0], [1], [0, 0, 1, 1], [], []>} : vector<8x8xbf16>, vector<8x32xbf16>, vector<8x32xf32> -> vector<8x32xf32>
    %c0_34 = arith.constant 0 : index
    %c96 = arith.constant 96 : index
    %91 = vector.load %arg7[%c0_34, %c96] : memref<8x128xf32, #tpu.memory_space<vmem>>, vector<8x32xf32>
    tpu.vector_store %arg7[%c0_34, %c96], %90 {strides = array<i32>} : memref<8x128xf32, #tpu.memory_space<vmem>>, vector<8x32xf32>,
    %c0_35 = arith.constant 0 : index
    %c0_36 = arith.constant 0 : index
    %92 = vector.load %arg7[%c0_35, %c0_36] : memref<8x128xf32, #tpu.memory_space<vmem>>, vector<8x128xf32>
    %93 = arith.truncf %92 : vector<8x128xf32> to vector<8x128xbf16>
    %c0_37 = arith.constant 0 : index
    %c0_38 = arith.constant 0 : index
    %c0_39 = arith.constant 0 : index
    %94 = vector.load %arg6[%c0_37, %c0_38, %c0_39] : memref<1x8x128xbf16, #tpu.memory_space<vmem>>, vector<1x8x128xbf16>
    %95 = vector.shape_cast %94 : vector<1x8x128xbf16> to vector<8x128xbf16>
    %96 = vector.shape_cast %93 : vector<8x128xbf16> to vector<1x8x128xbf16>
    tpu.vector_store %arg6[%c0_37, %c0_38, %c0_39], %96 {strides = array<i32>} : memref<1x8x128xbf16, #tpu.memory_space<vmem>>, vector<1x8x128xbf16>,
    return
  }
  func.func @transform_0(%arg0: i32, %arg1: i32) -> (i32, i32, i32) {
    %c0_i32 = arith.constant 0 : i32
    %c0_i32_0 = arith.constant 0 : i32
    return %arg0, %arg1, %c0_i32 : i32, i32, i32
  }
  func.func @transform_1(%arg0: i32, %arg1: i32) -> (i32, i32, i32) {
    %c0_i32 = arith.constant 0 : i32
    %c1_i32 = arith.constant 1 : i32
    %c0_i32_0 = arith.constant 0 : i32
    return %arg0, %c0_i32, %c1_i32 : i32, i32, i32
  }
  func.func @transform_2(%arg0: i32, %arg1: i32) -> (i32, i32, i32) {
    %c0_i32 = arith.constant 0 : i32
    %c2_i32 = arith.constant 2 : i32
    %c0_i32_0 = arith.constant 0 : i32
    return %arg0, %c0_i32, %c2_i32 : i32, i32, i32
  }
  func.func @transform_3(%arg0: i32, %arg1: i32) -> (i32, i32, i32) {
    %c0_i32 = arith.constant 0 : i32
    %c0_i32_0 = arith.constant 0 : i32
    %c0_i32_1 = arith.constant 0 : i32
    return %arg0, %c0_i32, %c0_i32_0 : i32, i32, i32
  }
  func.func @transform_4(%arg0: i32, %arg1: i32) -> (i32, i32, i32) {
    %c0_i32 = arith.constant 0 : i32
    %c0_i32_0 = arith.constant 0 : i32
    return %arg0, %arg1, %c0_i32 : i32, i32, i32
  }
}

module attributes {stable_mosaic.version = 11 : i64} {
  func.func @_emb_ln_kernel(%arg0: i32, %arg1: i32, %arg2: memref<1x8x128xf32, #tpu.memory_space<vmem>>, %arg3: memref<8x128xf32, #tpu.memory_space<vmem>>, %arg4: memref<1x128xf32, #tpu.memory_space<vmem>>, %arg5: memref<1x128xf32, #tpu.memory_space<vmem>>, %arg6: memref<1x128xf32, #tpu.memory_space<vmem>>, %arg7: memref<1x8x128xbf16, #tpu.memory_space<vmem>>) attributes {dimension_semantics = [#tpu.dimension_semantics<parallel>, #tpu.dimension_semantics<parallel>], iteration_bounds = array<i64: 2, 1>, scalar_prefetch = 0 : i64, scratch_operands = 0 : i64, tpu.core_type = #tpu.core_type<tc>, window_params = [{transform_indices = @transform_0, window_bounds = array<i64: 1, 8, 128>}, {transform_indices = @transform_1, window_bounds = array<i64: 8, 128>}, {pipeline_mode = #tpu.pipeline_mode<synchronous>, transform_indices = @transform_2, window_bounds = array<i64: 1, 128>}, {pipeline_mode = #tpu.pipeline_mode<synchronous>, transform_indices = @transform_3, window_bounds = array<i64: 1, 128>}, {pipeline_mode = #tpu.pipeline_mode<synchronous>, transform_indices = @transform_4, window_bounds = array<i64: 1, 128>}, {transform_indices = @transform_5, window_bounds = array<i64: 1, 8, 128>}]} {
    %c0 = arith.constant 0 : index
    %c0_0 = arith.constant 0 : index
    %c0_1 = arith.constant 0 : index
    %0 = vector.load %arg2[%c0, %c0_0, %c0_1] : memref<1x8x128xf32, #tpu.memory_space<vmem>>, vector<1x8x128xf32>
    %1 = vector.shape_cast %0 : vector<1x8x128xf32> to vector<8x128xf32>
    %c0_2 = arith.constant 0 : index
    %c0_3 = arith.constant 0 : index
    %2 = vector.load %arg3[%c0_2, %c0_3] : memref<8x128xf32, #tpu.memory_space<vmem>>, vector<8x128xf32>
    %3 = arith.addf %1, %2 : vector<8x128xf32>
    %c0_4 = arith.constant 0 : index
    %c0_5 = arith.constant 0 : index
    %4 = vector.load %arg4[%c0_4, %c0_5] : memref<1x128xf32, #tpu.memory_space<vmem>>, vector<1x128xf32>
    %5 = vector.broadcast %4 : vector<1x128xf32> to vector<8x128xf32>
    %6 = arith.addf %3, %5 : vector<8x128xf32>
    %cst = arith.constant dense<0.000000e+00> : vector<8xf32>
    %7 = vector.multi_reduction <add>, %6, %cst [1] : vector<8x128xf32> to vector<8xf32>
    %8 = vector.shape_cast %7 : vector<8xf32> to vector<8x1xf32>
    %cst_6 = arith.constant 1.280000e+02 : f32
    %9 = vector.broadcast %cst_6 : f32 to vector<8x1xf32>
    %10 = arith.divf %8, %9 : vector<8x1xf32>
    %11 = vector.broadcast %10 : vector<8x1xf32> to vector<8x128xf32>
    %12 = arith.subf %6, %11 : vector<8x128xf32>
    %13 = arith.mulf %12, %12 : vector<8x128xf32>
    %cst_7 = arith.constant dense<0.000000e+00> : vector<8xf32>
    %14 = vector.multi_reduction <add>, %13, %cst_7 [1] : vector<8x128xf32> to vector<8xf32>
    %15 = vector.shape_cast %14 : vector<8xf32> to vector<8x1xf32>
    %cst_8 = arith.constant 1.280000e+02 : f32
    %16 = vector.broadcast %cst_8 : f32 to vector<8x1xf32>
    %17 = arith.divf %15, %16 : vector<8x1xf32>
    %18 = vector.broadcast %10 : vector<8x1xf32> to vector<8x128xf32>
    %19 = arith.subf %6, %18 : vector<8x128xf32>
    %cst_9 = arith.constant 9.99999996E-13 : f32
    %20 = vector.broadcast %cst_9 : f32 to vector<8x1xf32>
    %21 = arith.addf %17, %20 : vector<8x1xf32>
    %22 = math.rsqrt %21 : vector<8x1xf32>
    %23 = vector.broadcast %22 : vector<8x1xf32> to vector<8x128xf32>
    %24 = arith.mulf %19, %23 : vector<8x128xf32>
    %c0_10 = arith.constant 0 : index
    %c0_11 = arith.constant 0 : index
    %25 = vector.load %arg5[%c0_10, %c0_11] : memref<1x128xf32, #tpu.memory_space<vmem>>, vector<1x128xf32>
    %26 = vector.broadcast %25 : vector<1x128xf32> to vector<8x128xf32>
    %27 = arith.mulf %24, %26 : vector<8x128xf32>
    %c0_12 = arith.constant 0 : index
    %c0_13 = arith.constant 0 : index
    %28 = vector.load %arg6[%c0_12, %c0_13] : memref<1x128xf32, #tpu.memory_space<vmem>>, vector<1x128xf32>
    %29 = vector.broadcast %28 : vector<1x128xf32> to vector<8x128xf32>
    %30 = arith.addf %27, %29 : vector<8x128xf32>
    %31 = arith.truncf %30 : vector<8x128xf32> to vector<8x128xbf16>
    %c0_14 = arith.constant 0 : index
    %c0_15 = arith.constant 0 : index
    %c0_16 = arith.constant 0 : index
    %32 = vector.load %arg7[%c0_14, %c0_15, %c0_16] : memref<1x8x128xbf16, #tpu.memory_space<vmem>>, vector<1x8x128xbf16>
    %33 = vector.shape_cast %32 : vector<1x8x128xbf16> to vector<8x128xbf16>
    %34 = vector.shape_cast %31 : vector<8x128xbf16> to vector<1x8x128xbf16>
    tpu.vector_store %arg7[%c0_14, %c0_15, %c0_16], %34 {strides = array<i32>} : memref<1x8x128xbf16, #tpu.memory_space<vmem>>, vector<1x8x128xbf16>,
    return
  }
  func.func @transform_0(%arg0: i32, %arg1: i32) -> (i32, i32, i32) {
    %c0_i32 = arith.constant 0 : i32
    %c0_i32_0 = arith.constant 0 : i32
    return %arg0, %arg1, %c0_i32 : i32, i32, i32
  }
  func.func @transform_1(%arg0: i32, %arg1: i32) -> (i32, i32) {
    %c0_i32 = arith.constant 0 : i32
    %c0_i32_0 = arith.constant 0 : i32
    return %arg1, %c0_i32 : i32, i32
  }
  func.func @transform_2(%arg0: i32, %arg1: i32) -> (i32, i32) {
    %c0_i32 = arith.constant 0 : i32
    %c0_i32_0 = arith.constant 0 : i32
    %c0_i32_1 = arith.constant 0 : i32
    return %c0_i32, %c0_i32_0 : i32, i32
  }
  func.func @transform_3(%arg0: i32, %arg1: i32) -> (i32, i32) {
    %c0_i32 = arith.constant 0 : i32
    %c0_i32_0 = arith.constant 0 : i32
    %c0_i32_1 = arith.constant 0 : i32
    return %c0_i32, %c0_i32_0 : i32, i32
  }
  func.func @transform_4(%arg0: i32, %arg1: i32) -> (i32, i32) {
    %c0_i32 = arith.constant 0 : i32
    %c0_i32_0 = arith.constant 0 : i32
    %c0_i32_1 = arith.constant 0 : i32
    return %c0_i32, %c0_i32_0 : i32, i32
  }
  func.func @transform_5(%arg0: i32, %arg1: i32) -> (i32, i32, i32) {
    %c0_i32 = arith.constant 0 : i32
    %c0_i32_0 = arith.constant 0 : i32
    return %arg0, %arg1, %c0_i32 : i32, i32, i32
  }
}

module attributes {stable_mosaic.version = 11 : i64} {
  func.func @_dense_kernel(%arg0: i32, %arg1: i32, %arg2: memref<16x128xbf16, #tpu.memory_space<vmem>>, %arg3: memref<128x384xbf16, #tpu.memory_space<vmem>>, %arg4: memref<1x384xf32, #tpu.memory_space<vmem>>, %arg5: memref<16x384xbf16, #tpu.memory_space<vmem>>) attributes {dimension_semantics = [#tpu.dimension_semantics<parallel>, #tpu.dimension_semantics<parallel>], iteration_bounds = array<i64: 1, 1>, scalar_prefetch = 0 : i64, scratch_operands = 0 : i64, tpu.core_type = #tpu.core_type<tc>, window_params = [{transform_indices = @transform_0, window_bounds = array<i64: 16, 128>}, {transform_indices = @transform_1, window_bounds = array<i64: 128, 384>}, {transform_indices = @transform_2, window_bounds = array<i64: 1, 384>}, {transform_indices = @transform_3, window_bounds = array<i64: 16, 384>}]} {
    %c0 = arith.constant 0 : index
    %c0_0 = arith.constant 0 : index
    %0 = vector.load %arg2[%c0, %c0_0] : memref<16x128xbf16, #tpu.memory_space<vmem>>, vector<16x128xbf16>
    %c0_1 = arith.constant 0 : index
    %c0_2 = arith.constant 0 : index
    %1 = vector.load %arg3[%c0_1, %c0_2] : memref<128x384xbf16, #tpu.memory_space<vmem>>, vector<128x384xbf16>
    %cst = arith.constant dense<0.000000e+00> : vector<16x384xf32>
    %2 = tpu.matmul %0, %1, %cst {dimension_numbers = #tpu.dot_dimension_numbers<[1], [0], [0], [1], [0, 0, 1, 1], [], []>} : vector<16x128xbf16>, vector<128x384xbf16>, vector<16x384xf32> -> vector<16x384xf32>
    %c0_3 = arith.constant 0 : index
    %c0_4 = arith.constant 0 : index
    %3 = vector.load %arg4[%c0_3, %c0_4] : memref<1x384xf32, #tpu.memory_space<vmem>>, vector<1x384xf32>
    %4 = vector.broadcast %3 : vector<1x384xf32> to vector<16x384xf32>
    %5 = arith.addf %2, %4 : vector<16x384xf32>
    %6 = arith.truncf %5 : vector<16x384xf32> to vector<16x384xbf16>
    %c0_5 = arith.constant 0 : index
    %c0_6 = arith.constant 0 : index
    %7 = vector.load %arg5[%c0_5, %c0_6] : memref<16x384xbf16, #tpu.memory_space<vmem>>, vector<16x384xbf16>
    tpu.vector_store %arg5[%c0_5, %c0_6], %6 {strides = array<i32>} : memref<16x384xbf16, #tpu.memory_space<vmem>>, vector<16x384xbf16>,
    return
  }
  func.func @transform_0(%arg0: i32, %arg1: i32) -> (i32, i32) {
    %c0_i32 = arith.constant 0 : i32
    %c0_i32_0 = arith.constant 0 : i32
    return %arg1, %c0_i32 : i32, i32
  }
  func.func @transform_1(%arg0: i32, %arg1: i32) -> (i32, i32) {
    %c0_i32 = arith.constant 0 : i32
    %c0_i32_0 = arith.constant 0 : i32
    return %c0_i32, %arg0 : i32, i32
  }
  func.func @transform_2(%arg0: i32, %arg1: i32) -> (i32, i32) {
    %c0_i32 = arith.constant 0 : i32
    %c0_i32_0 = arith.constant 0 : i32
    return %c0_i32, %arg0 : i32, i32
  }
  func.func @transform_3(%arg0: i32, %arg1: i32) -> (i32, i32) {
    %c0_i32 = arith.constant 0 : i32
    return %arg1, %arg0 : i32, i32
  }
}

module attributes {stable_mosaic.version = 11 : i64} {
  func.func @_dense_res_ln_kernel(%arg0: i32, %arg1: memref<16x128xbf16, #tpu.memory_space<vmem>>, %arg2: memref<128x128xbf16, #tpu.memory_space<vmem>>, %arg3: memref<1x128xf32, #tpu.memory_space<vmem>>, %arg4: memref<16x128xbf16, #tpu.memory_space<vmem>>, %arg5: memref<1x128xf32, #tpu.memory_space<vmem>>, %arg6: memref<1x128xf32, #tpu.memory_space<vmem>>, %arg7: memref<16x128xbf16, #tpu.memory_space<vmem>>) attributes {dimension_semantics = [#tpu.dimension_semantics<parallel>], iteration_bounds = array<i64: 1>, scalar_prefetch = 0 : i64, scratch_operands = 0 : i64, tpu.core_type = #tpu.core_type<tc>, window_params = [{transform_indices = @transform_0, window_bounds = array<i64: 16, 128>}, {pipeline_mode = #tpu.pipeline_mode<synchronous>, transform_indices = @transform_1, window_bounds = array<i64: 128, 128>}, {pipeline_mode = #tpu.pipeline_mode<synchronous>, transform_indices = @transform_2, window_bounds = array<i64: 1, 128>}, {transform_indices = @transform_3, window_bounds = array<i64: 16, 128>}, {pipeline_mode = #tpu.pipeline_mode<synchronous>, transform_indices = @transform_4, window_bounds = array<i64: 1, 128>}, {pipeline_mode = #tpu.pipeline_mode<synchronous>, transform_indices = @transform_5, window_bounds = array<i64: 1, 128>}, {transform_indices = @transform_6, window_bounds = array<i64: 16, 128>}]} {
    %c0 = arith.constant 0 : index
    %c0_0 = arith.constant 0 : index
    %0 = vector.load %arg1[%c0, %c0_0] : memref<16x128xbf16, #tpu.memory_space<vmem>>, vector<16x128xbf16>
    %c0_1 = arith.constant 0 : index
    %c0_2 = arith.constant 0 : index
    %1 = vector.load %arg2[%c0_1, %c0_2] : memref<128x128xbf16, #tpu.memory_space<vmem>>, vector<128x128xbf16>
    %cst = arith.constant dense<0.000000e+00> : vector<16x128xf32>
    %2 = tpu.matmul %0, %1, %cst {dimension_numbers = #tpu.dot_dimension_numbers<[1], [0], [0], [1], [0, 0, 1, 1], [], []>} : vector<16x128xbf16>, vector<128x128xbf16>, vector<16x128xf32> -> vector<16x128xf32>
    %c0_3 = arith.constant 0 : index
    %c0_4 = arith.constant 0 : index
    %3 = vector.load %arg3[%c0_3, %c0_4] : memref<1x128xf32, #tpu.memory_space<vmem>>, vector<1x128xf32>
    %4 = vector.broadcast %3 : vector<1x128xf32> to vector<16x128xf32>
    %5 = arith.addf %2, %4 : vector<16x128xf32>
    %c0_5 = arith.constant 0 : index
    %c0_6 = arith.constant 0 : index
    %6 = vector.load %arg4[%c0_5, %c0_6] : memref<16x128xbf16, #tpu.memory_space<vmem>>, vector<16x128xbf16>
    %7 = arith.extf %6 : vector<16x128xbf16> to vector<16x128xf32>
    %8 = arith.addf %5, %7 : vector<16x128xf32>
    %cst_7 = arith.constant dense<0.000000e+00> : vector<16xf32>
    %9 = vector.multi_reduction <add>, %8, %cst_7 [1] : vector<16x128xf32> to vector<16xf32>
    %10 = vector.shape_cast %9 : vector<16xf32> to vector<16x1xf32>
    %cst_8 = arith.constant 1.280000e+02 : f32
    %11 = vector.broadcast %cst_8 : f32 to vector<16x1xf32>
    %12 = arith.divf %10, %11 : vector<16x1xf32>
    %13 = vector.broadcast %12 : vector<16x1xf32> to vector<16x128xf32>
    %14 = arith.subf %8, %13 : vector<16x128xf32>
    %15 = arith.mulf %14, %14 : vector<16x128xf32>
    %cst_9 = arith.constant dense<0.000000e+00> : vector<16xf32>
    %16 = vector.multi_reduction <add>, %15, %cst_9 [1] : vector<16x128xf32> to vector<16xf32>
    %17 = vector.shape_cast %16 : vector<16xf32> to vector<16x1xf32>
    %cst_10 = arith.constant 1.280000e+02 : f32
    %18 = vector.broadcast %cst_10 : f32 to vector<16x1xf32>
    %19 = arith.divf %17, %18 : vector<16x1xf32>
    %20 = vector.broadcast %12 : vector<16x1xf32> to vector<16x128xf32>
    %21 = arith.subf %8, %20 : vector<16x128xf32>
    %cst_11 = arith.constant 9.99999996E-13 : f32
    %22 = vector.broadcast %cst_11 : f32 to vector<16x1xf32>
    %23 = arith.addf %19, %22 : vector<16x1xf32>
    %24 = math.rsqrt %23 : vector<16x1xf32>
    %25 = vector.broadcast %24 : vector<16x1xf32> to vector<16x128xf32>
    %26 = arith.mulf %21, %25 : vector<16x128xf32>
    %c0_12 = arith.constant 0 : index
    %c0_13 = arith.constant 0 : index
    %27 = vector.load %arg5[%c0_12, %c0_13] : memref<1x128xf32, #tpu.memory_space<vmem>>, vector<1x128xf32>
    %28 = vector.broadcast %27 : vector<1x128xf32> to vector<16x128xf32>
    %29 = arith.mulf %26, %28 : vector<16x128xf32>
    %c0_14 = arith.constant 0 : index
    %c0_15 = arith.constant 0 : index
    %30 = vector.load %arg6[%c0_14, %c0_15] : memref<1x128xf32, #tpu.memory_space<vmem>>, vector<1x128xf32>
    %31 = vector.broadcast %30 : vector<1x128xf32> to vector<16x128xf32>
    %32 = arith.addf %29, %31 : vector<16x128xf32>
    %33 = arith.truncf %32 : vector<16x128xf32> to vector<16x128xbf16>
    %c0_16 = arith.constant 0 : index
    %c0_17 = arith.constant 0 : index
    %34 = vector.load %arg7[%c0_16, %c0_17] : memref<16x128xbf16, #tpu.memory_space<vmem>>, vector<16x128xbf16>
    tpu.vector_store %arg7[%c0_16, %c0_17], %33 {strides = array<i32>} : memref<16x128xbf16, #tpu.memory_space<vmem>>, vector<16x128xbf16>,
    return
  }
  func.func @transform_0(%arg0: i32) -> (i32, i32) {
    %c0_i32 = arith.constant 0 : i32
    %c0_i32_0 = arith.constant 0 : i32
    return %arg0, %c0_i32 : i32, i32
  }
  func.func @transform_1(%arg0: i32) -> (i32, i32) {
    %c0_i32 = arith.constant 0 : i32
    %c0_i32_0 = arith.constant 0 : i32
    %c0_i32_1 = arith.constant 0 : i32
    return %c0_i32, %c0_i32_0 : i32, i32
  }
  func.func @transform_2(%arg0: i32) -> (i32, i32) {
    %c0_i32 = arith.constant 0 : i32
    %c0_i32_0 = arith.constant 0 : i32
    %c0_i32_1 = arith.constant 0 : i32
    return %c0_i32, %c0_i32_0 : i32, i32
  }
  func.func @transform_3(%arg0: i32) -> (i32, i32) {
    %c0_i32 = arith.constant 0 : i32
    %c0_i32_0 = arith.constant 0 : i32
    return %arg0, %c0_i32 : i32, i32
  }
  func.func @transform_4(%arg0: i32) -> (i32, i32) {
    %c0_i32 = arith.constant 0 : i32
    %c0_i32_0 = arith.constant 0 : i32
    %c0_i32_1 = arith.constant 0 : i32
    return %c0_i32, %c0_i32_0 : i32, i32
  }
  func.func @transform_5(%arg0: i32) -> (i32, i32) {
    %c0_i32 = arith.constant 0 : i32
    %c0_i32_0 = arith.constant 0 : i32
    %c0_i32_1 = arith.constant 0 : i32
    return %c0_i32, %c0_i32_0 : i32, i32
  }
  func.func @transform_6(%arg0: i32) -> (i32, i32) {
    %c0_i32 = arith.constant 0 : i32
    %c0_i32_0 = arith.constant 0 : i32
    return %arg0, %c0_i32 : i32, i32
  }
}

module attributes {stable_mosaic.version = 11 : i64} {
  func.func @_dense_kernel(%arg0: i32, %arg1: i32, %arg2: memref<16x128xbf16, #tpu.memory_space<vmem>>, %arg3: memref<128x256xbf16, #tpu.memory_space<vmem>>, %arg4: memref<1x256xf32, #tpu.memory_space<vmem>>, %arg5: memref<16x256xbf16, #tpu.memory_space<vmem>>) attributes {dimension_semantics = [#tpu.dimension_semantics<parallel>, #tpu.dimension_semantics<parallel>], iteration_bounds = array<i64: 1, 1>, scalar_prefetch = 0 : i64, scratch_operands = 0 : i64, tpu.core_type = #tpu.core_type<tc>, window_params = [{transform_indices = @transform_0, window_bounds = array<i64: 16, 128>}, {transform_indices = @transform_1, window_bounds = array<i64: 128, 256>}, {transform_indices = @transform_2, window_bounds = array<i64: 1, 256>}, {transform_indices = @transform_3, window_bounds = array<i64: 16, 256>}]} {
    %c0 = arith.constant 0 : index
    %c0_0 = arith.constant 0 : index
    %0 = vector.load %arg2[%c0, %c0_0] : memref<16x128xbf16, #tpu.memory_space<vmem>>, vector<16x128xbf16>
    %c0_1 = arith.constant 0 : index
    %c0_2 = arith.constant 0 : index
    %1 = vector.load %arg3[%c0_1, %c0_2] : memref<128x256xbf16, #tpu.memory_space<vmem>>, vector<128x256xbf16>
    %cst = arith.constant dense<0.000000e+00> : vector<16x256xf32>
    %2 = tpu.matmul %0, %1, %cst {dimension_numbers = #tpu.dot_dimension_numbers<[1], [0], [0], [1], [0, 0, 1, 1], [], []>} : vector<16x128xbf16>, vector<128x256xbf16>, vector<16x256xf32> -> vector<16x256xf32>
    %c0_3 = arith.constant 0 : index
    %c0_4 = arith.constant 0 : index
    %3 = vector.load %arg4[%c0_3, %c0_4] : memref<1x256xf32, #tpu.memory_space<vmem>>, vector<1x256xf32>
    %4 = vector.broadcast %3 : vector<1x256xf32> to vector<16x256xf32>
    %5 = arith.addf %2, %4 : vector<16x256xf32>
    %cst_5 = arith.constant 5.000000e-01 : f32
    %6 = vector.broadcast %cst_5 : f32 to vector<16x256xf32>
    %7 = arith.mulf %6, %5 : vector<16x256xf32>
    %cst_6 = arith.constant 4.471500e-02 : f32
    %8 = vector.broadcast %cst_6 : f32 to vector<16x256xf32>
    %9 = arith.mulf %8, %5 : vector<16x256xf32>
    %10 = arith.mulf %9, %5 : vector<16x256xf32>
    %11 = arith.mulf %10, %5 : vector<16x256xf32>
    %12 = arith.addf %5, %11 : vector<16x256xf32>
    %cst_7 = arith.constant 0.797884583 : f32
    %13 = vector.broadcast %cst_7 : f32 to vector<16x256xf32>
    %14 = arith.mulf %13, %12 : vector<16x256xf32>
    %15 = math.tanh %14 : vector<16x256xf32>
    %cst_8 = arith.constant 1.000000e+00 : f32
    %16 = vector.broadcast %cst_8 : f32 to vector<16x256xf32>
    %17 = arith.addf %16, %15 : vector<16x256xf32>
    %18 = arith.mulf %7, %17 : vector<16x256xf32>
    %19 = arith.truncf %18 : vector<16x256xf32> to vector<16x256xbf16>
    %c0_9 = arith.constant 0 : index
    %c0_10 = arith.constant 0 : index
    %20 = vector.load %arg5[%c0_9, %c0_10] : memref<16x256xbf16, #tpu.memory_space<vmem>>, vector<16x256xbf16>
    tpu.vector_store %arg5[%c0_9, %c0_10], %19 {strides = array<i32>} : memref<16x256xbf16, #tpu.memory_space<vmem>>, vector<16x256xbf16>,
    return
  }
  func.func @transform_0(%arg0: i32, %arg1: i32) -> (i32, i32) {
    %c0_i32 = arith.constant 0 : i32
    %c0_i32_0 = arith.constant 0 : i32
    return %arg1, %c0_i32 : i32, i32
  }
  func.func @transform_1(%arg0: i32, %arg1: i32) -> (i32, i32) {
    %c0_i32 = arith.constant 0 : i32
    %c0_i32_0 = arith.constant 0 : i32
    return %c0_i32, %arg0 : i32, i32
  }
  func.func @transform_2(%arg0: i32, %arg1: i32) -> (i32, i32) {
    %c0_i32 = arith.constant 0 : i32
    %c0_i32_0 = arith.constant 0 : i32
    return %c0_i32, %arg0 : i32, i32
  }
  func.func @transform_3(%arg0: i32, %arg1: i32) -> (i32, i32) {
    %c0_i32 = arith.constant 0 : i32
    return %arg1, %arg0 : i32, i32
  }
}

module attributes {stable_mosaic.version = 11 : i64} {
  func.func @_dense_res_ln_kernel(%arg0: i32, %arg1: memref<16x256xbf16, #tpu.memory_space<vmem>>, %arg2: memref<256x128xbf16, #tpu.memory_space<vmem>>, %arg3: memref<1x128xf32, #tpu.memory_space<vmem>>, %arg4: memref<16x128xbf16, #tpu.memory_space<vmem>>, %arg5: memref<1x128xf32, #tpu.memory_space<vmem>>, %arg6: memref<1x128xf32, #tpu.memory_space<vmem>>, %arg7: memref<16x128xbf16, #tpu.memory_space<vmem>>) attributes {dimension_semantics = [#tpu.dimension_semantics<parallel>], iteration_bounds = array<i64: 1>, scalar_prefetch = 0 : i64, scratch_operands = 0 : i64, tpu.core_type = #tpu.core_type<tc>, window_params = [{transform_indices = @transform_0, window_bounds = array<i64: 16, 256>}, {pipeline_mode = #tpu.pipeline_mode<synchronous>, transform_indices = @transform_1, window_bounds = array<i64: 256, 128>}, {pipeline_mode = #tpu.pipeline_mode<synchronous>, transform_indices = @transform_2, window_bounds = array<i64: 1, 128>}, {transform_indices = @transform_3, window_bounds = array<i64: 16, 128>}, {pipeline_mode = #tpu.pipeline_mode<synchronous>, transform_indices = @transform_4, window_bounds = array<i64: 1, 128>}, {pipeline_mode = #tpu.pipeline_mode<synchronous>, transform_indices = @transform_5, window_bounds = array<i64: 1, 128>}, {transform_indices = @transform_6, window_bounds = array<i64: 16, 128>}]} {
    %c0 = arith.constant 0 : index
    %c0_0 = arith.constant 0 : index
    %0 = vector.load %arg1[%c0, %c0_0] : memref<16x256xbf16, #tpu.memory_space<vmem>>, vector<16x256xbf16>
    %c0_1 = arith.constant 0 : index
    %c0_2 = arith.constant 0 : index
    %1 = vector.load %arg2[%c0_1, %c0_2] : memref<256x128xbf16, #tpu.memory_space<vmem>>, vector<256x128xbf16>
    %cst = arith.constant dense<0.000000e+00> : vector<16x128xf32>
    %2 = tpu.matmul %0, %1, %cst {dimension_numbers = #tpu.dot_dimension_numbers<[1], [0], [0], [1], [0, 0, 1, 1], [], []>} : vector<16x256xbf16>, vector<256x128xbf16>, vector<16x128xf32> -> vector<16x128xf32>
    %c0_3 = arith.constant 0 : index
    %c0_4 = arith.constant 0 : index
    %3 = vector.load %arg3[%c0_3, %c0_4] : memref<1x128xf32, #tpu.memory_space<vmem>>, vector<1x128xf32>
    %4 = vector.broadcast %3 : vector<1x128xf32> to vector<16x128xf32>
    %5 = arith.addf %2, %4 : vector<16x128xf32>
    %c0_5 = arith.constant 0 : index
    %c0_6 = arith.constant 0 : index
    %6 = vector.load %arg4[%c0_5, %c0_6] : memref<16x128xbf16, #tpu.memory_space<vmem>>, vector<16x128xbf16>
    %7 = arith.extf %6 : vector<16x128xbf16> to vector<16x128xf32>
    %8 = arith.addf %5, %7 : vector<16x128xf32>
    %cst_7 = arith.constant dense<0.000000e+00> : vector<16xf32>
    %9 = vector.multi_reduction <add>, %8, %cst_7 [1] : vector<16x128xf32> to vector<16xf32>
    %10 = vector.shape_cast %9 : vector<16xf32> to vector<16x1xf32>
    %cst_8 = arith.constant 1.280000e+02 : f32
    %11 = vector.broadcast %cst_8 : f32 to vector<16x1xf32>
    %12 = arith.divf %10, %11 : vector<16x1xf32>
    %13 = vector.broadcast %12 : vector<16x1xf32> to vector<16x128xf32>
    %14 = arith.subf %8, %13 : vector<16x128xf32>
    %15 = arith.mulf %14, %14 : vector<16x128xf32>
    %cst_9 = arith.constant dense<0.000000e+00> : vector<16xf32>
    %16 = vector.multi_reduction <add>, %15, %cst_9 [1] : vector<16x128xf32> to vector<16xf32>
    %17 = vector.shape_cast %16 : vector<16xf32> to vector<16x1xf32>
    %cst_10 = arith.constant 1.280000e+02 : f32
    %18 = vector.broadcast %cst_10 : f32 to vector<16x1xf32>
    %19 = arith.divf %17, %18 : vector<16x1xf32>
    %20 = vector.broadcast %12 : vector<16x1xf32> to vector<16x128xf32>
    %21 = arith.subf %8, %20 : vector<16x128xf32>
    %cst_11 = arith.constant 9.99999996E-13 : f32
    %22 = vector.broadcast %cst_11 : f32 to vector<16x1xf32>
    %23 = arith.addf %19, %22 : vector<16x1xf32>
    %24 = math.rsqrt %23 : vector<16x1xf32>
    %25 = vector.broadcast %24 : vector<16x1xf32> to vector<16x128xf32>
    %26 = arith.mulf %21, %25 : vector<16x128xf32>
    %c0_12 = arith.constant 0 : index
    %c0_13 = arith.constant 0 : index
    %27 = vector.load %arg5[%c0_12, %c0_13] : memref<1x128xf32, #tpu.memory_space<vmem>>, vector<1x128xf32>
    %28 = vector.broadcast %27 : vector<1x128xf32> to vector<16x128xf32>
    %29 = arith.mulf %26, %28 : vector<16x128xf32>
    %c0_14 = arith.constant 0 : index
    %c0_15 = arith.constant 0 : index
    %30 = vector.load %arg6[%c0_14, %c0_15] : memref<1x128xf32, #tpu.memory_space<vmem>>, vector<1x128xf32>
    %31 = vector.broadcast %30 : vector<1x128xf32> to vector<16x128xf32>
    %32 = arith.addf %29, %31 : vector<16x128xf32>
    %33 = arith.truncf %32 : vector<16x128xf32> to vector<16x128xbf16>
    %c0_16 = arith.constant 0 : index
    %c0_17 = arith.constant 0 : index
    %34 = vector.load %arg7[%c0_16, %c0_17] : memref<16x128xbf16, #tpu.memory_space<vmem>>, vector<16x128xbf16>
    tpu.vector_store %arg7[%c0_16, %c0_17], %33 {strides = array<i32>} : memref<16x128xbf16, #tpu.memory_space<vmem>>, vector<16x128xbf16>,
    return
  }
  func.func @transform_0(%arg0: i32) -> (i32, i32) {
    %c0_i32 = arith.constant 0 : i32
    %c0_i32_0 = arith.constant 0 : i32
    return %arg0, %c0_i32 : i32, i32
  }
  func.func @transform_1(%arg0: i32) -> (i32, i32) {
    %c0_i32 = arith.constant 0 : i32
    %c0_i32_0 = arith.constant 0 : i32
    %c0_i32_1 = arith.constant 0 : i32
    return %c0_i32, %c0_i32_0 : i32, i32
  }
  func.func @transform_2(%arg0: i32) -> (i32, i32) {
    %c0_i32 = arith.constant 0 : i32
    %c0_i32_0 = arith.constant 0 : i32
    %c0_i32_1 = arith.constant 0 : i32
    return %c0_i32, %c0_i32_0 : i32, i32
  }
  func.func @transform_3(%arg0: i32) -> (i32, i32) {
    %c0_i32 = arith.constant 0 : i32
    %c0_i32_0 = arith.constant 0 : i32
    return %arg0, %c0_i32 : i32, i32
  }
  func.func @transform_4(%arg0: i32) -> (i32, i32) {
    %c0_i32 = arith.constant 0 : i32
    %c0_i32_0 = arith.constant 0 : i32
    %c0_i32_1 = arith.constant 0 : i32
    return %c0_i32, %c0_i32_0 : i32, i32
  }
  func.func @transform_5(%arg0: i32) -> (i32, i32) {
    %c0_i32 = arith.constant 0 : i32
    %c0_i32_0 = arith.constant 0 : i32
    %c0_i32_1 = arith.constant 0 : i32
    return %c0_i32, %c0_i32_0 : i32, i32
  }
  func.func @transform_6(%arg0: i32) -> (i32, i32) {
    %c0_i32 = arith.constant 0 : i32
    %c0_i32_0 = arith.constant 0 : i32
    return %arg0, %c0_i32 : i32, i32
  }
}

module attributes {stable_mosaic.version = 11 : i64} {
  func.func @_pooler_fc_kernel(%arg0: memref<2x128xbf16, #tpu.memory_space<vmem>>, %arg1: memref<2x5xf32, #tpu.memory_space<vmem>>, %arg2: memref<128x128xbf16, #tpu.memory_space<vmem>>, %arg3: memref<1x128xf32, #tpu.memory_space<vmem>>, %arg4: memref<133x2xbf16, #tpu.memory_space<vmem>>, %arg5: memref<1x2xf32, #tpu.memory_space<vmem>>, %arg6: memref<2x2xf32, #tpu.memory_space<vmem>>) attributes {dimension_semantics = [], scalar_prefetch = 0 : i64, scratch_operands = 0 : i64, tpu.core_type = #tpu.core_type<tc>} {
    %c0 = arith.constant 0 : index
    %c0_0 = arith.constant 0 : index
    %0 = vector.load %arg0[%c0, %c0_0] : memref<2x128xbf16, #tpu.memory_space<vmem>>, vector<2x128xbf16>
    %c0_1 = arith.constant 0 : index
    %c0_2 = arith.constant 0 : index
    %1 = vector.load %arg2[%c0_1, %c0_2] : memref<128x128xbf16, #tpu.memory_space<vmem>>, vector<128x128xbf16>
    %cst = arith.constant dense<0.000000e+00> : vector<2x128xf32>
    %2 = tpu.matmul %0, %1, %cst {dimension_numbers = #tpu.dot_dimension_numbers<[1], [0], [0], [1], [0, 0, 1, 1], [], []>} : vector<2x128xbf16>, vector<128x128xbf16>, vector<2x128xf32> -> vector<2x128xf32>
    %c0_3 = arith.constant 0 : index
    %c0_4 = arith.constant 0 : index
    %3 = vector.load %arg3[%c0_3, %c0_4] : memref<1x128xf32, #tpu.memory_space<vmem>>, vector<1x128xf32>
    %4 = vector.broadcast %3 : vector<1x128xf32> to vector<2x128xf32>
    %5 = arith.addf %2, %4 : vector<2x128xf32>
    %6 = math.tanh %5 : vector<2x128xf32>
    %c0_5 = arith.constant 0 : index
    %c0_6 = arith.constant 0 : index
    %7 = vector.load %arg4[%c0_5, %c0_6] : memref<133x2xbf16, #tpu.memory_space<vmem>>, vector<128x2xbf16>
    %c128 = arith.constant 128 : index
    %c0_7 = arith.constant 0 : index
    %8 = vector.load %arg4[%c128, %c0_7] : memref<133x2xbf16, #tpu.memory_space<vmem>>, vector<5x2xbf16>
    %9 = arith.truncf %6 : vector<2x128xf32> to vector<2x128xbf16>
    %cst_8 = arith.constant dense<0.000000e+00> : vector<2x2xf32>
    %10 = tpu.matmul %9, %7, %cst_8 {dimension_numbers = #tpu.dot_dimension_numbers<[1], [0], [0], [1], [0, 0, 1, 1], [], []>} : vector<2x128xbf16>, vector<128x2xbf16>, vector<2x2xf32> -> vector<2x2xf32>
    %c0_9 = arith.constant 0 : index
    %c0_10 = arith.constant 0 : index
    %11 = vector.load %arg1[%c0_9, %c0_10] : memref<2x5xf32, #tpu.memory_space<vmem>>, vector<2x5xf32>
    %12 = arith.truncf %11 : vector<2x5xf32> to vector<2x5xbf16>
    %cst_11 = arith.constant dense<0.000000e+00> : vector<2x2xf32>
    %13 = tpu.matmul %12, %8, %cst_11 {dimension_numbers = #tpu.dot_dimension_numbers<[1], [0], [0], [1], [0, 0, 1, 1], [], []>} : vector<2x5xbf16>, vector<5x2xbf16>, vector<2x2xf32> -> vector<2x2xf32>
    %14 = arith.addf %10, %13 : vector<2x2xf32>
    %c0_12 = arith.constant 0 : index
    %c0_13 = arith.constant 0 : index
    %15 = vector.load %arg5[%c0_12, %c0_13] : memref<1x2xf32, #tpu.memory_space<vmem>>, vector<1x2xf32>
    %16 = vector.broadcast %15 : vector<1x2xf32> to vector<2x2xf32>
    %17 = arith.addf %14, %16 : vector<2x2xf32>
    %c0_14 = arith.constant 0 : index
    %c0_15 = arith.constant 0 : index
    %18 = vector.load %arg6[%c0_14, %c0_15] : memref<2x2xf32, #tpu.memory_space<vmem>>, vector<2x2xf32>
    tpu.vector_store %arg6[%c0_14, %c0_15], %17 {strides = array<i32>} : memref<2x2xf32, #tpu.memory_space<vmem>>, vector<2x2xf32>,
    return
  }
}

</mosaic_0001>

<bundles_post_ra>
// kernel: bert_with_additional_features.12
= control target key start
LH: loop header
LB: loop body
LE: loop exit
PB: predicated region body
PF: predicated region fallthrough
CT: control target
= control target key end

     0   :  { %s492_s18 = smov 0   ;;  %s494_s19 = smov 0   ;;  %s537_s0 = inlined_call_operand.vmem [shape: f32[2,8,128], index: 0, kind: input, shape index: {}]   ;;  %s538_s1 = inlined_call_operand.vmem [shape: f32[8,128], index: 1, kind: input, shape index: {}]   ;;  %s539_s2 = inlined_call_operand.vmem [shape: f32[1,128], index: 2, kind: input, shape index: {}]   ;;  %s540_s3 = inlined_call_operand.vmem [shape: f32[1,128], index: 3, kind: input, shape index: {}]   ;;  %s541_s4 = inlined_call_operand.vmem [shape: f32[1,128], index: 4, kind: input, shape index: {}]   ;;  %s542_s5 = inlined_call_operand.vmem [shape: bf16[2,8,128], index: 5, kind: output, shape index: {}]  }
   0x1   :  { %s496_s20 = smov 0  }
   0x2 LB: > { %s27_s21 = sadd.s32 1, %s456_s19  ;;  %p404_p0 = scmp.ge.s32.totalorder %s460_s20, 1  ;;  %s460_s20 = sphi %s496_s20, %s15_s20   ;;  %s456_s19 = sphi %s494_s19, %s544_s19   ;;  %s452_s18 = sphi %s492_s18, %s543_s18  }
   0x3   : > { %p29_p1 = scmp.ge.s32.totalorder %s27_s21, 2  ;;  %p214_p2 = scmp.lt.s32.totalorder %s460_s20, 3 }
   0x5   : > { %s546_s21 = smov (%p29_p1, %s27_s21), 0  ;;  %p215_p3 = pnand %p404_p0, %p214_p2 }
   0x6   : > { %p250_p4 = scmp.lt.s32.totalorder (!%p215_p3), %s452_s18, 1 }
   0x7   : > { %218 = sbr.rel (%p215_p3) target bundleno = 329 (0x149), region = 40 }
   0xc   : > { %s548_s18 = smov (!%p250_p4, %s452_s18), 1  ;;  %v269_v0 = vld [vmem:[%s538_s1] sm:$0xff] }
   0xd   : > { %s405_s22 = sshll.u32 %s548_s18, 3  ;;  %v407_v2 = vld [vmem:[%s539_s2] ss:$0 sm:$0xff]  ;;  %s406_s9 = sshll.u32 %s548_s18, 2 }
   0xe   : > { %s256_s27 = scalar_lea.vmem %s537_s0, %s405_s22  ;;  %v408_v13 = vld [vmem:[%s540_s3] ss:$0 sm:$0xff]  ;;  %s267_s12 = scalar_lea.vmem %s542_s5, %s406_s9 }
   0xf   : > { %v268_v1 = vld [vmem:[%s256_s27] sm:$0xff] }
  0x10   : > { %v270_v3 = vadd.f32 %v269_v0, %v268_v1  ;;  %v409_v15 = vld [vmem:[%s541_s4] ss:$0 sm:$0xff] }
  0x12   : > { %v278_v4 = vadd.f32 %v407_v2, %v270_v3 }
  0x14   : > { %279 = vadd.xlane.f32.xlu0 %v278_v4 }
  0x9d   : > { %v280_v5 = vpop.xlane.xlu0 %279 }
  0x9e   : > { %v282_v6 = vmul.f32 0.0078125, %v280_v5 }
  0xa0   : > { %v283_v7 = vsub.f32 %v278_v4, %v282_v6 }
  0xa2   : > { %v284_v8 = vmul.f32 %v283_v7, %v283_v7 }
  0xa4   : > { %285 = vadd.xlane.f32.xlu0 %v284_v8 }
 0x12d   : > { %v286_v9 = vpop.xlane.xlu0 %285 }
 0x12e   : > { %v287_v10 = vmul.f32 0.0078125, %v286_v9 }
 0x130   : > { %v288_v11 = vadd.f32 1e-12, %v287_v10 }
 0x132   : > { %436 = vrsqrt.f32 %v288_v11 }
 0x13f   : > { %v437_v12 = vpop.eup %436 }
 0x140   : > { %v290_v14 = vmul.f32 %v437_v12, %v283_v7 }
 0x142   : > { %v298_v16 = vmul.f32 %v408_v13, %v290_v14 }
 0x144   : > { %v306_v17 = vadd.f32 %v409_v15, %v298_v16 }
 0x146   : > { %v307_v18 = vpack.c.bf16 %v306_v17, %v306_v17 }
 0x148   : > { %308 = vst [vmem:[%s267_s12] sm:$0xf] %v307_v18 }
 0x149 PF: > { %s15_s20 = sadd.s32 1, %s460_s20   ;;  %s543_s18 = smov %s456_s19 }
 0x14a   : > { %p12_p5 = scmp.ge.s32.totalorder %s15_s20, 4   ;;  %s544_s19 = smov %s546_s21 }
 0x14c   :  { %14 = sbr.rel (!%p12_p5) target bundleno = 2 (0x2), region = 73 }

// kernel: bert_with_additional_features.14
= control target key start
LH: loop header
LB: loop body
LE: loop exit
PB: predicated region body
PF: predicated region fallthrough
CT: control target
= control target key end

     0   :  { %s1094_s15 = smov 0   ;;  %s1096_s16 = smov 0   ;;  %s1218_s0 = inlined_call_operand.vmem [shape: bf16[2,8,384], index: 0, kind: input, shape index: {}, may-alias: {0,1,2}]   ;;  %s1219_s1 = inlined_call_operand.vmem [shape: bf16[2,8,384], index: 1, kind: input, shape index: {}, may-alias: {0,1,2}]   ;;  %s1220_s2 = inlined_call_operand.vmem [shape: bf16[2,8,384], index: 2, kind: input, shape index: {}, may-alias: {0,1,2}]   ;;  %s1221_s3 = inlined_call_operand.vmem [shape: f32[2,1,8], index: 3, kind: input, shape index: {}]   ;;  %s1222_s4 = inlined_call_operand.vmem [shape: bf16[2,8,128], index: 4, kind: output, shape index: {}]  }
   0x1   :  { %s1098_s17 = smov 0  }
   0x2 LB: > { %s26_s18 = sadd.s32 1, %s1058_s16  ;;  %p906_p0 = scmp.ge.s32.totalorder %s1062_s17, 1  ;;  %s1062_s17 = sphi %s1098_s17, %s14_s17   ;;  %s1058_s16 = sphi %s1096_s16, %s1224_s16   ;;  %s1054_s15 = sphi %s1094_s15, %s1223_s15  }
   0x3   : > { %p28_p1 = scmp.ge.s32.totalorder %s26_s18, 2  ;;  %p212_p2 = scmp.lt.s32.totalorder %s1062_s17, 3 }
   0x5   : > { %s1226_s18 = smov (%p28_p1, %s26_s18), 0  ;;  %p213_p3 = pnand %p906_p0, %p212_p2 }
   0x6   : > { %p259_p4 = scmp.lt.s32.totalorder (!%p213_p3), %s1054_s15, 1  ;;  %s1066_s29 = smov (!%p213_p3), 96  }
   0x7   : > { %216 = sbr.rel (%p213_p3) target bundleno = 1427 (0x593), region = 36  ;;  %s1067_s30 = smov (!%p213_p3), 64  }
   0x8   : > { %s1068_s5 = smov (!%p213_p3), 32  }
   0xc   : > { %v1064_v0 = vmov 0.0   ;;  %vm1065_vm0 = vmmov 0   ;;  %s1228_s15 = smov (!%p259_p4, %s1054_s15), 1  ;;  %vm295_vm1 = vcmask 261120   ;;  %vm350_vm2 = vcmask 64512  }
   0xd   : > { %943 = vmatprep.subr.bf16.mxu0 %v1064_v0  ;;  %945 = vmatprep.mubr.msk.bf16.mxu0 %vm1065_vm0, %v1064_v0  ;;  %s1121_s19 = smul.u32 12, %s1228_s15  ;;  %s282_s28 = scalar_lea.vmem %s1221_s3, %s1228_s15  ;;  %vm366_vm3 = vcmask 1043456   ;;  %vm536_vm4 = vcmask 523520   ;;  %vm654_vm5 = vcmask 785920   ;;  %vm772_vm6 = vcmask 1048320  }
   0xe   : > { %949 = vmatprep.subr.bf16.mxu1 %v1064_v0  ;;  %951 = vmatprep.mubr.msk.bf16.mxu1 %vm1065_vm0, %v1064_v0  ;;  %v1140_v5 = vld [vmem:[%s282_s28] ss:$0 sm:$0xff]  ;;  %s910_s9 = sshll.u32 %s1228_s15, 2 }
   0xf   : > { %s840_s22 = scalar_lea.vmem %s1219_s1, %s1121_s19  ;;  %s267_s25 = scalar_lea.vmem %s1218_s0, %s1121_s19 }
  0x10   : > { %v911_v1 = vld [vmem:[%s840_s22 + $0x4] sm:$0xf]  ;;  %v291_v3 = vld [vmem:[%s267_s25] sm:$0xf]  ;;  %s844_s8 = scalar_lea.vmem %s1220_s2, %s1121_s19  ;;  %s289_s12 = scalar_lea.vmem %s1222_s4, %s910_s9 }
  0x11   : > { %v300_v2 = vsel %vm295_vm1, %v911_v1, 0  ;;  %v917_v12 = vcombine.low %v911_v1, %v911_v1  ;;  %v916_v13 = vcombine.low %v291_v3, %v291_v3  ;;  %v1154_v19 = vld [vmem:[%s844_s8 + $0x8] sm:$0xf] }
  0x12   : > { %944 = vmatpush3.bf16.xpose.msra.mxu0 %v300_v2  ;;  %v368_v20 = vsel %vm366_vm3, %v1154_v19, 0 }
  0x13   : > { %961 = vmatprep.subr.bf16.mxu0 %v1064_v0  ;;  %419 = vrot.lane.b32.xlu1 %v917_v12, %s1066_s29 }
  0x14   : > { %950 = vmatpush3.bf16.msra.mxu1 %v368_v20 }
  0x15   : > { %955 = vmatprep.subr.bf16.mxu1 %v1064_v0 }
  0x17   : > { %414 = vrot.lane.b32.xlu1 %v916_v13, %s1066_s29 }
  0x19   : > { %946 = vmatmul.mubr.msk.bf16.vlgmr.msra.gmra.mxu0 %vm295_vm1, %v291_v3 }
  0x1a   : > { %963 = vmatprep.mubr.msk.bf16.mxu0 %vm1065_vm0, %v1064_v0 }
  0x1b   : > { %538 = vrot.lane.b32.xlu1 %v916_v13, %s1067_s30 }
  0x1f   : > { %658 = vrot.lane.b32.xlu1 %v917_v12, %s1068_s5 }
  0x23   : > { %656 = vrot.lane.b32.xlu1 %v916_v13, %s1068_s5 }
  0x85   : > { %v420_v23 = vpop.permute.xlu1 %419 }
  0x86   : > { %v425_v25 = vsel %vm295_vm1, %v420_v23, 0 }
  0x89   : > { %v415_v27 = vpop.permute.xlu1 %414 }
  0x8d   : > { %v539_v29 = vpop.permute.xlu1 %538 }
  0x91   : > { %v659_v31 = vpop.permute.xlu1 %658 }
  0x92   : > { %v664_v32 = vsel %vm295_vm1, %v659_v31, 0 }
  0x95   : > { %v657_v33 = vpop.permute.xlu1 %656 }
  0xd9   : > { %v336_v4 = vpop.f32.mrf.mxu0 }
  0xda   : > { %v342_v6 = vmul.f32 0.17677669, %v336_v4 }
  0xdb   : > { %v947_v7 = vpop.f32.mrf.mxu0 }
  0xdc   : > { %v349_v8 = vadd.f32 %v1140_v5, %v342_v6  ;;  %v919_v6 = vcombine.low %v1154_v19, %v1154_v19 }
  0xdd   : > { %v339_v9 = vpop.f32.mrf.mxu0 }
  0xde   : > { %v351_v10 = vsel %vm350_vm2, %v349_v8, -inf }
  0xdf   : > { %352 = vmax.xlane.f32.xlu0 %v351_v10  ;;  %v948_v11 = vpop.f32.mrf.mxu0 }
 0x168   : > { %v353_v14 = vpop.xlane.xlu0 %352 }
 0x169   : > { %v354_v15 = vsub.f32 %v349_v8, %v353_v14 }
 0x16b   : > { %v355_v16 = vmul.f32 1.442695, %v354_v15 }
 0x16d   : > { %1024 = vpow2.f32 %v355_v16 }
 0x17a   : > { %v1025_v17 = vpop.eup %1024 }
 0x17b   : > { %v357_v18 = vsel %vm350_vm2, %v1025_v17, 0.0 }
 0x17c   : > { %358 = vadd.xlane.f32.xlu0 %v357_v18 }
 0x192   : > { %540 = vrot.lane.b32.xlu0 %v917_v12, %s1067_s30 }
 0x205   : > { %v359_v21 = vpop.xlane.xlu0 %358 }
 0x206   : > { %1026 = vrcp.f32 %v359_v21 }
 0x209   : > { %v541_v28 = vpop.permute.xlu0 %540 }
 0x20a   : > { %v546_v30 = vsel %vm295_vm1, %v541_v28, 0 }
 0x213   : > { %v1027_v22 = vpop.eup %1026 }
 0x214   : > { %v361_v24 = vmul.f32 %v1027_v22, %v1025_v17 }
 0x216   : > { %v362_v26 = vpack.c.bf16 %v361_v24, %v361_v24 }
 0x218   : > { %952 = vmatmul.mubr.msk.bf16.vlgmr.msra.gmra.mxu1 %vm350_vm2, %v362_v26 }
 0x219   : > { %956 = vmatpush3.bf16.xpose.msra.mxu1 %v425_v25  ;;  %957 = vmatprep.mubr.msk.bf16.mxu1 %vm1065_vm0, %v1064_v0 }
 0x21a   : > { %967 = vmatprep.subr.bf16.mxu1 %v1064_v0 }
 0x220   : > { %958 = vmatmul.mubr.msk.bf16.vlgmr.msra.gmra.mxu1 %vm295_vm1, %v415_v27 }
 0x221   : > { %968 = vmatpush3.bf16.xpose.msra.mxu1 %v546_v30  ;;  %969 = vmatprep.mubr.msk.bf16.mxu1 %vm1065_vm0, %v1064_v0 }
 0x222   : > { %979 = vmatprep.subr.bf16.mxu1 %v1064_v0 }
 0x228   : > { %970 = vmatmul.mubr.msk.bf16.vlgmr.msra.gmra.mxu1 %vm295_vm1, %v539_v29 }
 0x229   : > { %980 = vmatpush3.bf16.xpose.msra.mxu1 %v664_v32  ;;  %981 = vmatprep.mubr.msk.bf16.mxu1 %vm1065_vm0, %v1064_v0 }
 0x230   : > { %982 = vmatmul.mubr.msk.bf16.vlgmr.msra.gmra.mxu1 %vm295_vm1, %v657_v33 }
 0x2d8   : > { %v404_v34 = vpop.f32.mrf.mxu1 }
 0x2d9   : > { %410 = vst.msk [vmem:[#allocation2] sm:$0xff] %vm295_vm1, %v404_v34 }
 0x2da   : > { %v953_v35 = vpop.f32.mrf.mxu1 }
 0x2dc   : > { %v407_v36 = vpop.f32.mrf.mxu1 }
 0x2de   : > { %v954_v37 = vpop.f32.mrf.mxu1 }
 0x2e0   : > { %v461_v38 = vpop.f32.mrf.mxu1 }
 0x2e1   : > { %v467_v39 = vmul.f32 0.17677669, %v461_v38 }
 0x2e2   : > { %v959_v40 = vpop.f32.mrf.mxu1 }
 0x2e3   : > { %v468_v41 = vadd.f32 %v1140_v5, %v467_v39 }
 0x2e4   : > { %v464_v42 = vpop.f32.mrf.mxu1 }
 0x2e5   : > { %v469_v43 = vsel %vm350_vm2, %v468_v41, -inf }
 0x2e6   : > { %470 = vmax.xlane.f32.xlu1 %v469_v43  ;;  %v960_v44 = vpop.f32.mrf.mxu1 }
 0x2e8   : > { %v582_v45 = vpop.f32.mrf.mxu1 }
 0x2e9   : > { %v588_v46 = vmul.f32 0.17677669, %v582_v45 }
 0x2ea   : > { %v971_v47 = vpop.f32.mrf.mxu1 }
 0x2eb   : > { %v589_v48 = vadd.f32 %v1140_v5, %v588_v46 }
 0x2ec   : > { %v585_v49 = vpop.f32.mrf.mxu1 }
 0x2ed   : > { %v590_v50 = vsel %vm350_vm2, %v589_v48, -inf }
 0x2ee   : > { %591 = vmax.xlane.f32.xlu0 %v590_v50  ;;  %v972_v51 = vpop.f32.mrf.mxu1 }
 0x2f0   : > { %v700_v52 = vpop.f32.mrf.mxu1 }
 0x2f1   : > { %v706_v53 = vmul.f32 0.17677669, %v700_v52 }
 0x2f2   : > { %v983_v54 = vpop.f32.mrf.mxu1 }
 0x2f3   : > { %v707_v55 = vadd.f32 %v1140_v5, %v706_v53 }
 0x2f4   : > { %v703_v56 = vpop.f32.mrf.mxu1 }
 0x2f5   : > { %v708_v57 = vsel %vm350_vm2, %v707_v55, -inf }
 0x2f6   : > { %709 = vmax.xlane.f32.xlu1 %v708_v57  ;;  %v984_v58 = vpop.f32.mrf.mxu1 }
 0x36f   : > { %v471_v59 = vpop.xlane.xlu1 %470 }
 0x370   : > { %v472_v60 = vsub.f32 %v468_v41, %v471_v59 }
 0x372   : > { %v473_v61 = vmul.f32 1.442695, %v472_v60 }
 0x374   : > { %1028 = vpow2.f32 %v473_v61 }
 0x377   : > { %v592_v62 = vpop.xlane.xlu0 %591 }
 0x378   : > { %v593_v63 = vsub.f32 %v589_v48, %v592_v62 }
 0x37a   : > { %v594_v1 = vmul.f32 1.442695, %v593_v63 }
 0x37c   : > { %1030 = vpow2.f32 %v594_v1 }
 0x37f   : > { %v710_v7 = vpop.xlane.xlu1 %709 }
 0x380   : > { %v711_v8 = vsub.f32 %v707_v55, %v710_v7 }
 0x381   : > { %v1029_v2 = vpop.eup %1028 }
 0x382   : > { %v475_v3 = vsel %vm350_vm2, %v1029_v2, 0.0  ;;  %v712_v9 = vmul.f32 1.442695, %v711_v8 }
 0x383   : > { %476 = vadd.xlane.f32.xlu1 %v475_v3 }
 0x384   : > { %1032 = vpow2.f32 %v712_v9 }
 0x389   : > { %v1031_v4 = vpop.eup %1030 }
 0x38a   : > { %v596_v5 = vsel %vm350_vm2, %v1031_v4, 0.0 }
 0x38b   : > { %597 = vadd.xlane.f32.xlu0 %v596_v5 }
 0x391   : > { %v1033_v10 = vpop.eup %1032 }
 0x392   : > { %v714_v11 = vsel %vm350_vm2, %v1033_v10, 0.0 }
 0x394   : > { %602 = vrot.lane.b32.xlu1 %v919_v6, %s1067_s30 }
 0x3a1   : > { %484 = vrot.lane.b32.xlu0 %v919_v6, %s1066_s29 }
 0x3b8   : > { %715 = vadd.xlane.f32.xlu1 %v714_v11 }
 0x3c9   : > { %720 = vrot.lane.b32.xlu1 %v919_v6, %s1068_s5 }
 0x40c   : > { %v477_v12 = vpop.xlane.xlu1 %476 }
 0x40d   : > { %1034 = vrcp.f32 %v477_v12 }
 0x410   : > { %v603_v18 = vpop.permute.xlu1 %602 }
 0x411   : > { %v608_v20 = vsel %vm366_vm3, %v603_v18, 0 }
 0x414   : > { %v598_v13 = vpop.xlane.xlu0 %597 }
 0x415   : > { %1036 = vrcp.f32 %v598_v13 }
 0x418   : > { %v485_v14 = vpop.permute.xlu0 %484 }
 0x419   : > { %v490_v15 = vsel %vm366_vm3, %v485_v14, 0 }
 0x41a   : > { %v1035_v16 = vpop.eup %1034  ;;  %962 = vmatpush3.bf16.msra.mxu0 %v490_v15 }
 0x41b   : > { %973 = vmatprep.subr.bf16.mxu0 %v1064_v0  ;;  %v479_v17 = vmul.f32 %v1035_v16, %v1029_v2 }
 0x41d   : > { %v480_v19 = vpack.c.bf16 %v479_v17, %v479_v17 }
 0x41f   : > { %964 = vmatmul.mubr.msk.bf16.vlgmr.msra.gmra.mxu0 %vm350_vm2, %v480_v19 }
 0x420   : > { %974 = vmatpush3.bf16.msra.mxu0 %v608_v20  ;;  %975 = vmatprep.mubr.msk.bf16.mxu0 %vm1065_vm0, %v1064_v0 }
 0x421   : > { %985 = vmatprep.subr.bf16.mxu0 %v1064_v0 }
 0x422   : > { %v1037_v21 = vpop.eup %1036 }
 0x423   : > { %v600_v22 = vmul.f32 %v1037_v21, %v1031_v4 }
 0x425   : > { %v601_v23 = vpack.c.bf16 %v600_v22, %v600_v22 }
 0x427   : > { %976 = vmatmul.mubr.msk.bf16.vlgmr.msra.gmra.mxu0 %vm350_vm2, %v601_v23 }
 0x428   : > { %987 = vmatprep.mubr.msk.bf16.mxu0 %vm1065_vm0, %v1064_v0 }
 0x441   : > { %v716_v24 = vpop.xlane.xlu1 %715 }
 0x442   : > { %1038 = vrcp.f32 %v716_v24 }
 0x445   : > { %v721_v25 = vpop.permute.xlu1 %720 }
 0x446   : > { %v726_v26 = vsel %vm366_vm3, %v721_v25, 0 }
 0x447   : > { %986 = vmatpush3.bf16.msra.mxu0 %v726_v26 }
 0x44f   : > { %v1039_v27 = vpop.eup %1038 }
 0x450   : > { %v718_v28 = vmul.f32 %v1039_v27, %v1033_v10 }
 0x452   : > { %v719_v29 = vpack.c.bf16 %v718_v28, %v718_v28 }
 0x454   : > { %988 = vmatmul.mubr.msk.bf16.vlgmr.msra.gmra.mxu0 %vm350_vm2, %v719_v29 }
 0x4df   : > { %v526_v30 = vpop.f32.mrf.mxu0 }
 0x4e0   : > { %533 = vrot.lane.b32.xlu0 %v526_v30, %s1068_s5 }
 0x4e1   : > { %v965_v31 = vpop.f32.mrf.mxu0 }
 0x4e3   : > { %v529_v32 = vpop.f32.mrf.mxu0 }
 0x4e5   : > { %v966_v33 = vpop.f32.mrf.mxu0 }
 0x4e7   : > { %v644_v34 = vpop.f32.mrf.mxu0 }
 0x4e8   : > { %651 = vrot.lane.b32.xlu1 %v644_v34, %s1067_s30 }
 0x4e9   : > { %v977_v0 = vpop.f32.mrf.mxu0 }
 0x4eb   : > { %v647_v35 = vpop.f32.mrf.mxu0 }
 0x4ed   : > { %v978_v36 = vpop.f32.mrf.mxu0 }
 0x514   : > { %v762_v37 = vpop.f32.mrf.mxu0 }
 0x515   : > { %769 = vrot.lane.b32.xlu0 %v762_v37, %s1066_s29 }
 0x516   : > { %v989_v38 = vpop.f32.mrf.mxu0 }
 0x518   : > { %v765_v39 = vpop.f32.mrf.mxu0 }
 0x51a   : > { %v990_v40 = vpop.f32.mrf.mxu0 }
 0x552   : > { %v534_v41 = vpop.permute.xlu0 %533 }
 0x553   : > { %537 = vst.msk [vmem:[#allocation2] sm:$0xff] %vm536_vm4, %v534_v41 }
 0x55a   : > { %v652_v42 = vpop.permute.xlu1 %651 }
 0x55b   : > { %655 = vst.msk [vmem:[#allocation2] sm:$0xff] %vm654_vm5, %v652_v42 }
 0x587   : > { %v770_v43 = vpop.permute.xlu0 %769 }
 0x588   : > { %773 = vst.msk [vmem:[#allocation2] sm:$0xff] %vm772_vm6, %v770_v43 }
 0x58f   : > { %v774_v44 = vld [vmem:[#allocation2] sm:$0xff] }
 0x590   : > { %v775_v45 = vpack.c.bf16 %v774_v44, %v774_v44 }
 0x592   : > { %776 = vst [vmem:[%s289_s12] sm:$0xf] %v775_v45 }
 0x593 PF: > { %s14_s17 = sadd.s32 1, %s1062_s17   ;;  %s1223_s15 = smov %s1058_s16 }
 0x594   : > { %p11_p5 = scmp.ge.s32.totalorder %s14_s17, 4   ;;  %s1224_s16 = smov %s1226_s18 }
 0x596   :  { %13 = sbr.rel (!%p11_p5) target bundleno = 2 (0x2), region = 75 }

// kernel: bert_with_additional_features.13
= control target key start
LH: loop header
LB: loop body
LE: loop exit
PB: predicated region body
PF: predicated region fallthrough
CT: control target
= control target key end

     0   :  { %v410_v0 = vmov 0.0   ;;  %vm411_vm0 = vmmov 0   ;;  %v412_v3 = vmov 0   ;;  %v51_v27 = vlaneseq  ;;  %s523_s1 = inlined_call_operand.vmem [shape: bf16[128,384], index: 1, kind: input, shape index: {}]   ;;  %s524_s0 = inlined_call_operand.vmem [shape: bf16[16,128], index: 0, kind: input, shape index: {}]   ;;  %s525_s2 = inlined_call_operand.vmem [shape: f32[1,384], index: 2, kind: input, shape index: {}]   ;;  %s526_s3 = inlined_call_operand.vmem [shape: bf16[16,384], index: 3, kind: output, shape index: {}]  }
   0x1   :  { %354 = vmatprep.subr.bf16.mxu1 %v410_v0  ;;  %v377_v1 = vld [vmem:[%s523_s1 + $0xac] ss:$12 sps:$4 sm:$0xff]   ;;  %370 = vmatprep.mubr.msk.bf16.mxu1 %vm411_vm0, %v410_v0  ;;  %v379_v2 = vld [vmem:[%s523_s1 + $0xb0] ss:$12 sps:$4 sm:$0xff]   ;;  %v380_v4 = vld [vmem:[%s523_s1 + $0xa8] ss:$12 sps:$4 sm:$0xff]  }
   0x2   :  { %232 = vmatprep.mubr.bf16.mxu0 %v412_v3  ;;  %200 = vmatprep.subr.bf16.mxu0 %v377_v1  ;;  %v381_v5 = vld [vmem:[%s523_s1 + $0x94] ss:$12 sps:$4 sm:$0xff]   ;;  %v383_v6 = vld [vmem:[%s523_s1 + $0x98] ss:$12 sps:$4 sm:$0xff]   ;;  %v384_v7 = vld [vmem:[%s523_s1 + $0x90] ss:$12 sps:$4 sm:$0xff]  }
   0x3   :  { %355 = vmatpush3.bf16.msra.mxu1 %v379_v2  ;;  %201 = vmatpush1.bf16.msra.mxu0 %v380_v4  ;;  %v385_v8 = vld [vmem:[%s523_s1 + $0x7c] ss:$12 sps:$4 sm:$0xff]   ;;  %v387_v9 = vld [vmem:[%s523_s1 + $0x80] ss:$12 sps:$4 sm:$0xff]   ;;  %v388_v10 = vld [vmem:[%s523_s1 + $0x78] ss:$12 sps:$4 sm:$0xff]  }
   0x4   :  { %356 = vmatprep.subr.bf16.mxu1 %v410_v0  ;;  %202 = vmatprep.subr.bf16.mxu0 %v381_v5  ;;  %v389_v11 = vld [vmem:[%s523_s1 + $0x64] ss:$12 sps:$4 sm:$0xff]   ;;  %v391_v12 = vld [vmem:[%s523_s1 + $0x68] ss:$12 sps:$4 sm:$0xff]   ;;  %v392_v13 = vld [vmem:[%s523_s1 + $0x60] ss:$12 sps:$4 sm:$0xff]  }
   0x5   :  { %v393_v14 = vld [vmem:[%s523_s1 + $0x4c] ss:$12 sps:$4 sm:$0xff]   ;;  %v395_v15 = vld [vmem:[%s523_s1 + $0x50] ss:$12 sps:$4 sm:$0xff]   ;;  %v396_v16 = vld [vmem:[%s523_s1 + $0x48] ss:$12 sps:$4 sm:$0xff]  }
   0x6   :  { %v397_v17 = vld [vmem:[%s523_s1 + $0x34] ss:$12 sps:$4 sm:$0xff]   ;;  %v399_v18 = vld [vmem:[%s523_s1 + $0x38] ss:$12 sps:$4 sm:$0xff]   ;;  %v400_v19 = vld [vmem:[%s523_s1 + $0x30] ss:$12 sps:$4 sm:$0xff]  }
   0x7   :  { %357 = vmatpush3.bf16.msra.mxu1 %v383_v6  ;;  %203 = vmatpush1.bf16.msra.mxu0 %v384_v7  ;;  %v401_v20 = vld [vmem:[%s523_s1 + $0x1c] ss:$12 sps:$4 sm:$0xff]   ;;  %v403_v21 = vld [vmem:[%s523_s1 + $0x20] ss:$12 sps:$4 sm:$0xff]   ;;  %v404_v22 = vld [vmem:[%s523_s1 + $0x18] ss:$12 sps:$4 sm:$0xff]  }
   0x8   :  { %358 = vmatprep.subr.bf16.mxu1 %v410_v0  ;;  %204 = vmatprep.subr.bf16.mxu0 %v385_v8  ;;  %v405_v23 = vld [vmem:[%s523_s1 + $0x4] ss:$12 sps:$4 sm:$0xff]   ;;  %v407_v24 = vld [vmem:[%s523_s1 + $0x8] ss:$12 sps:$4 sm:$0xff]   ;;  %v408_v25 = vld [vmem:[%s523_s1] ss:$12 sps:$4 sm:$0xff]  }
   0x9   :  { %v409_v26 = vld [vmem:[%s524_s0] sm:$0xff]   ;;  %v52_v28 = vshrl.u32 %v51_v27, 7 }
   0xa   :  { %v49_v30 = vld [vmem:[%s525_s2] sm:$0x7] }
   0xb   :  { %359 = vmatpush3.bf16.msra.mxu1 %v387_v9  ;;  %205 = vmatpush1.bf16.msra.mxu0 %v388_v10  ;;  %v61_v29 = vsub.s32 2, %v52_v28  ;;  %v53_v31 = vsub.s32 0, %v52_v28  ;;  %v57_v32 = vsub.s32 1, %v52_v28 }
   0xc   :  { %360 = vmatprep.subr.bf16.mxu1 %v410_v0  ;;  %206 = vmatprep.subr.bf16.mxu0 %v389_v11 }
   0xd   :  { %v62_v33 = vrot.slane %v49_v30, %v61_v29  ;;  %v54_v35 = vrot.slane %v49_v30, %v53_v31  ;;  %v58_v36 = vrot.slane %v49_v30, %v57_v32 }
   0xf   :  { %361 = vmatpush3.bf16.msra.mxu1 %v391_v12  ;;  %207 = vmatpush1.bf16.msra.mxu0 %v392_v13 }
  0x10   :  { %362 = vmatprep.subr.bf16.mxu1 %v410_v0  ;;  %208 = vmatprep.subr.bf16.mxu0 %v393_v14 }
  0x13   :  { %363 = vmatpush3.bf16.msra.mxu1 %v395_v15  ;;  %209 = vmatpush1.bf16.msra.mxu0 %v396_v16 }
  0x14   :  { %364 = vmatprep.subr.bf16.mxu1 %v410_v0  ;;  %210 = vmatprep.subr.bf16.mxu0 %v397_v17 }
  0x17   :  { %365 = vmatpush3.bf16.msra.mxu1 %v399_v18  ;;  %211 = vmatpush1.bf16.msra.mxu0 %v400_v19 }
  0x18   :  { %366 = vmatprep.subr.bf16.mxu1 %v410_v0  ;;  %212 = vmatprep.subr.bf16.mxu0 %v401_v20 }
  0x1b   :  { %367 = vmatpush3.bf16.msra.mxu1 %v403_v21  ;;  %213 = vmatpush1.bf16.msra.mxu0 %v404_v22 }
  0x1c   :  { %368 = vmatprep.subr.bf16.mxu1 %v410_v0  ;;  %214 = vmatprep.subr.bf16.mxu0 %v405_v23 }
  0x1f   :  { %369 = vmatpush3.bf16.msra.mxu1 %v407_v24  ;;  %215 = vmatpush1.bf16.msra.mxu0 %v408_v25 }
  0x22   :  { %371 = vmatmul.mubr.bf16.vlgmr.msra.gmra.mxu1 %v409_v26  ;;  %233 = vmatmul.mubr.bf16.vlgmr.msra.gmra.mxu0 %v409_v26 }
  0xe2   :  { %v277_v34 = vpop.f32.mrf.mxu1  ;;  %v234_v38 = vpop.f32.mrf.mxu0 }
  0xe3   :  { %v278_v37 = vadd.f32 %v277_v34, %v62_v33  ;;  %v235_v42 = vadd.f32 %v234_v38, %v54_v35 }
  0xe4   :  { %v372_v39 = vpop.f32.mrf.mxu1  ;;  %v236_v41 = vpop.f32.mrf.mxu0 }
  0xe5   :  { %v342_v40 = vpack.c.bf16 %v278_v37, %v278_v37  ;;  %v237_v43 = vadd.f32 %v236_v41, %v58_v36 }
  0xe6   :  { %v280_v44 = vpop.f32.mrf.mxu1  ;;  %v238_v46 = vpop.f32.mrf.mxu0 }
  0xe7   :  { %305 = vst [vmem:[%s526_s3 + $0x8] sm:$0xf] %v342_v40  ;;  %v281_v45 = vadd.f32 %v280_v44, %v62_v33  ;;  %v341_v47 = vpack.c.bf16 %v237_v43, %v235_v42  ;;  %v239_v51 = vadd.f32 %v238_v46, %v54_v35 }
  0xe8   :  { %v373_v48 = vpop.f32.mrf.mxu1  ;;  %v240_v50 = vpop.f32.mrf.mxu0 }
  0xe9   :  { %v344_v49 = vpack.c.bf16 %v281_v45, %v281_v45  ;;  %304 = vst [vmem:[%s526_s3] sm:$0xff] %v341_v47  ;;  %v241_v52 = vadd.f32 %v240_v50, %v58_v36 }
  0xeb   :  { %307 = vst [vmem:[%s526_s3 + $0x14] sm:$0xf] %v344_v49  ;;  %v343_v53 = vpack.c.bf16 %v241_v52, %v239_v51 }
  0xed   :  { %306 = vst [vmem:[%s526_s3 + $0xc] sm:$0xff] %v343_v53 }

// kernel: bert_with_additional_features.15
= control target key start
LH: loop header
LB: loop body
LE: loop exit
PB: predicated region body
PF: predicated region fallthrough
CT: control target
= control target key end

     0   :  { %v274_v0 = vmov 0.0   ;;  %vm275_vm0 = vmmov 0   ;;  %s353_s1 = inlined_call_operand.vmem [shape: bf16[128,128], index: 1, kind: input, shape index: {}]   ;;  %s354_s0 = inlined_call_operand.vmem [shape: bf16[16,128], index: 0, kind: input, shape index: {}]   ;;  %s355_s3 = inlined_call_operand.vmem [shape: bf16[16,128], index: 3, kind: input, shape index: {}]   ;;  %s356_s2 = inlined_call_operand.vmem [shape: f32[1,128], index: 2, kind: input, shape index: {}]   ;;  %s357_s4 = inlined_call_operand.vmem [shape: f32[1,128], index: 4, kind: input, shape index: {}]   ;;  %s358_s5 = inlined_call_operand.vmem [shape: f32[1,128], index: 5, kind: input, shape index: {}]   ;;  %s359_s6 = inlined_call_operand.vmem [shape: bf16[16,128], index: 6, kind: output, shape index: {}]  }
   0x1   :  { %239 = vmatprep.subr.bf16.mxu0 %v274_v0  ;;  %v261_v1 = vld [vmem:[%s353_s1 + $0x38] sm:$0xff]   ;;  %255 = vmatprep.mubr.msk.bf16.mxu0 %vm275_vm0, %v274_v0  ;;  %v262_v2 = vld [vmem:[%s353_s1 + $0x30] sm:$0xff]   ;;  %v263_v3 = vld [vmem:[%s353_s1 + $0x28] sm:$0xff]  }
   0x2   :  { %240 = vmatpush3.bf16.msra.mxu0 %v261_v1  ;;  %v264_v4 = vld [vmem:[%s353_s1 + $0x20] sm:$0xff]   ;;  %v265_v5 = vld [vmem:[%s353_s1 + $0x18] sm:$0xff]   ;;  %v266_v6 = vld [vmem:[%s353_s1 + $0x10] sm:$0xff]  }
   0x3   :  { %241 = vmatprep.subr.bf16.mxu0 %v274_v0  ;;  %v267_v7 = vld [vmem:[%s353_s1 + $0x8] sm:$0xff]   ;;  %v268_v8 = vld [vmem:[%s353_s1] sm:$0xff]  }
   0x4   :  { %v269_v9 = vld [vmem:[%s354_s0] sm:$0xff]  }
   0x5   :  { %v222_v10 = vld [vmem:[%s355_s3] sm:$0xff]  }
   0x6   :  { %242 = vmatpush3.bf16.msra.mxu0 %v262_v2  ;;  %v205_v11 = vld [vmem:[%s356_s2] ss:$0 sm:$0xff]  ;;  %v223_v12 = vunpack.c.l.bf16 %v222_v10  ;;  %v224_v17 = vunpack.c.h.bf16 %v222_v10 }
   0x7   :  { %243 = vmatprep.subr.bf16.mxu0 %v274_v0  ;;  %v215_v38 = vld [vmem:[%s357_s4] ss:$0 sm:$0xff] }
   0x8   :  { %v216_v42 = vld [vmem:[%s358_s5] ss:$0 sm:$0xff] }
   0xa   :  { %244 = vmatpush3.bf16.msra.mxu0 %v263_v3 }
   0xb   :  { %245 = vmatprep.subr.bf16.mxu0 %v274_v0 }
   0xe   :  { %246 = vmatpush3.bf16.msra.mxu0 %v264_v4 }
   0xf   :  { %247 = vmatprep.subr.bf16.mxu0 %v274_v0 }
  0x12   :  { %248 = vmatpush3.bf16.msra.mxu0 %v265_v5 }
  0x13   :  { %249 = vmatprep.subr.bf16.mxu0 %v274_v0 }
  0x16   :  { %250 = vmatpush3.bf16.msra.mxu0 %v266_v6 }
  0x17   :  { %251 = vmatprep.subr.bf16.mxu0 %v274_v0 }
  0x1a   :  { %252 = vmatpush3.bf16.msra.mxu0 %v267_v7 }
  0x1b   :  { %253 = vmatprep.subr.bf16.mxu0 %v274_v0 }
  0x1e   :  { %254 = vmatpush3.bf16.msra.mxu0 %v268_v8 }
  0x21   :  { %256 = vmatmul.mubr.bf16.vlgmr.msra.gmra.mxu0 %v269_v9 }
  0xe1   :  { %v137_v13 = vpop.f32.mrf.mxu0 }
  0xe2   :  { %v138_v14 = vadd.f32 %v205_v11, %v137_v13 }
  0xe3   :  { %v257_v15 = vpop.f32.mrf.mxu0 }
  0xe4   :  { %v148_v16 = vadd.f32 %v223_v12, %v138_v14 }
  0xe5   :  { %v140_v18 = vpop.f32.mrf.mxu0 }
  0xe6   :  { %v141_v19 = vadd.f32 %v205_v11, %v140_v18  ;;  %150 = vadd.xlane.f32.xlu0 %v148_v16 }
  0xe7   :  { %v258_v20 = vpop.f32.mrf.mxu0 }
  0xe8   :  { %v149_v21 = vadd.f32 %v224_v17, %v141_v19 }
  0xea   :  { %152 = vadd.xlane.f32.xlu0 %v149_v21 }
 0x16f   :  { %v151_v22 = vpop.xlane.xlu0 %150 }
 0x170   :  { %v155_v23 = vmul.f32 0.0078125, %v151_v22 }
 0x172   :  { %v157_v24 = vsub.f32 %v148_v16, %v155_v23 }
 0x173   :  { %v153_v25 = vpop.xlane.xlu0 %152 }
 0x174   :  { %v156_v26 = vmul.f32 0.0078125, %v153_v25  ;;  %v159_v27 = vmul.f32 %v157_v24, %v157_v24 }
 0x176   :  { %v158_v28 = vsub.f32 %v149_v21, %v156_v26  ;;  %161 = vadd.xlane.f32.xlu1 %v159_v27 }
 0x178   :  { %v160_v29 = vmul.f32 %v158_v28, %v158_v28 }
 0x17a   :  { %163 = vadd.xlane.f32.xlu1 %v160_v29 }
 0x1ff   :  { %v162_v30 = vpop.xlane.xlu1 %161 }
 0x200   :  { %v165_v31 = vmul.f32 0.0078125, %v162_v30 }
 0x202   :  { %v167_v32 = vadd.f32 1e-12, %v165_v31 }
 0x203   :  { %v164_v33 = vpop.xlane.xlu1 %163 }
 0x204   :  { %270 = vrsqrt.f32 %v167_v32  ;;  %v166_v34 = vmul.f32 0.0078125, %v164_v33 }
 0x206   :  { %v168_v35 = vadd.f32 1e-12, %v166_v34 }
 0x208   :  { %272 = vrsqrt.f32 %v168_v35 }
 0x211   :  { %v271_v36 = vpop.eup %270 }
 0x212   :  { %v171_v37 = vmul.f32 %v271_v36, %v157_v24 }
 0x214   :  { %v180_v40 = vmul.f32 %v215_v38, %v171_v37 }
 0x215   :  { %v273_v39 = vpop.eup %272 }
 0x216   :  { %v172_v41 = vmul.f32 %v273_v39, %v158_v28  ;;  %v189_v44 = vadd.f32 %v216_v42, %v180_v40 }
 0x218   :  { %v181_v43 = vmul.f32 %v215_v38, %v172_v41 }
 0x21a   :  { %v190_v45 = vadd.f32 %v216_v42, %v181_v43 }
 0x21c   :  { %v228_v46 = vpack.c.bf16 %v190_v45, %v189_v44 }
 0x21e   :  { %229 = vst [vmem:[%s359_s6] sm:$0xff] %v228_v46  }

// kernel: bert_with_additional_features.16
= control target key start
LH: loop header
LB: loop body
LE: loop exit
PB: predicated region body
PF: predicated region fallthrough
CT: control target
= control target key end

     0   :  { %v283_v1 = vmov 0   ;;  %v35_v18 = vlaneseq  ;;  %s364_s1 = inlined_call_operand.vmem [shape: bf16[128,256], index: 1, kind: input, shape index: {}]   ;;  %s365_s0 = inlined_call_operand.vmem [shape: bf16[16,128], index: 0, kind: input, shape index: {}]   ;;  %s366_s2 = inlined_call_operand.vmem [shape: f32[1,256], index: 2, kind: input, shape index: {}]   ;;  %s367_s3 = inlined_call_operand.vmem [shape: bf16[16,256], index: 3, kind: output, shape index: {}]  }
   0x1   :  { %v250_v0 = vld [vmem:[%s364_s1 + $0x74] ss:$8 sps:$4 sm:$0xff]   ;;  %163 = vmatprep.mubr.bf16.mxu0 %v283_v1  ;;  %v252_v2 = vld [vmem:[%s364_s1 + $0x70] ss:$8 sps:$4 sm:$0xff]   ;;  %v253_v3 = vld [vmem:[%s364_s1 + $0x64] ss:$8 sps:$4 sm:$0xff]  }
   0x2   :  { %131 = vmatprep.subr.bf16.mxu0 %v250_v0  ;;  %v255_v4 = vld [vmem:[%s364_s1 + $0x60] ss:$8 sps:$4 sm:$0xff]   ;;  %v256_v5 = vld [vmem:[%s364_s1 + $0x54] ss:$8 sps:$4 sm:$0xff]   ;;  %v258_v6 = vld [vmem:[%s364_s1 + $0x50] ss:$8 sps:$4 sm:$0xff]  }
   0x3   :  { %132 = vmatpush1.bf16.msra.mxu0 %v252_v2  ;;  %v259_v7 = vld [vmem:[%s364_s1 + $0x44] ss:$8 sps:$4 sm:$0xff]   ;;  %v261_v8 = vld [vmem:[%s364_s1 + $0x40] ss:$8 sps:$4 sm:$0xff]   ;;  %v262_v9 = vld [vmem:[%s364_s1 + $0x34] ss:$8 sps:$4 sm:$0xff]  }
   0x4   :  { %133 = vmatprep.subr.bf16.mxu0 %v253_v3  ;;  %v264_v10 = vld [vmem:[%s364_s1 + $0x30] ss:$8 sps:$4 sm:$0xff]   ;;  %v265_v11 = vld [vmem:[%s364_s1 + $0x24] ss:$8 sps:$4 sm:$0xff]   ;;  %v267_v12 = vld [vmem:[%s364_s1 + $0x20] ss:$8 sps:$4 sm:$0xff]  }
   0x5   :  { %v268_v13 = vld [vmem:[%s364_s1 + $0x14] ss:$8 sps:$4 sm:$0xff]   ;;  %v270_v14 = vld [vmem:[%s364_s1 + $0x10] ss:$8 sps:$4 sm:$0xff]   ;;  %v271_v15 = vld [vmem:[%s364_s1 + $0x4] ss:$8 sps:$4 sm:$0xff]  }
   0x6   :  { %v273_v16 = vld [vmem:[%s364_s1] ss:$8 sps:$4 sm:$0xff]   ;;  %v36_v19 = vshrl.u32 %v35_v18, 7 }
   0x7   :  { %134 = vmatpush1.bf16.msra.mxu0 %v255_v4  ;;  %v274_v17 = vld [vmem:[%s365_s0] sm:$0xff]  }
   0x8   :  { %135 = vmatprep.subr.bf16.mxu0 %v256_v5  ;;  %v37_v20 = vsub.s32 0, %v36_v19  ;;  %v33_v21 = vld [vmem:[%s366_s2] sm:$0x3]  ;;  %v41_v22 = vsub.s32 1, %v36_v19 }
   0xa   :  { %v38_v23 = vrot.slane %v33_v21, %v37_v20  ;;  %v42_v24 = vrot.slane %v33_v21, %v41_v22 }
   0xb   :  { %136 = vmatpush1.bf16.msra.mxu0 %v258_v6 }
   0xc   :  { %137 = vmatprep.subr.bf16.mxu0 %v259_v7 }
   0xf   :  { %138 = vmatpush1.bf16.msra.mxu0 %v261_v8 }
  0x10   :  { %139 = vmatprep.subr.bf16.mxu0 %v262_v9 }
  0x13   :  { %140 = vmatpush1.bf16.msra.mxu0 %v264_v10 }
  0x14   :  { %141 = vmatprep.subr.bf16.mxu0 %v265_v11 }
  0x17   :  { %142 = vmatpush1.bf16.msra.mxu0 %v267_v12 }
  0x18   :  { %143 = vmatprep.subr.bf16.mxu0 %v268_v13 }
  0x1b   :  { %144 = vmatpush1.bf16.msra.mxu0 %v270_v14 }
  0x1c   :  { %145 = vmatprep.subr.bf16.mxu0 %v271_v15 }
  0x1f   :  { %146 = vmatpush1.bf16.msra.mxu0 %v273_v16 }
  0x22   :  { %164 = vmatmul.mubr.bf16.vlgmr.msra.gmra.mxu0 %v274_v17 }
  0xe2   :  { %v165_v25 = vpop.f32.mrf.mxu0 }
  0xe3   :  { %v166_v26 = vadd.f32 %v165_v25, %v38_v23 }
  0xe4   :  { %v167_v27 = vpop.f32.mrf.mxu0 }
  0xe5   :  { %v178_v28 = vmul.f32 0.044715, %v166_v26  ;;  %v168_v29 = vadd.f32 %v167_v27, %v42_v24  ;;  %v174_v56 = vmul.f32 0.5, %v166_v26 }
  0xe6   :  { %v169_v30 = vpop.f32.mrf.mxu0 }
  0xe7   :  { %v182_v31 = vmul.f32 %v178_v28, %v166_v26  ;;  %v179_v32 = vmul.f32 0.044715, %v168_v29  ;;  %v170_v33 = vadd.f32 %v169_v30, %v38_v23  ;;  %v175_v57 = vmul.f32 0.5, %v168_v29 }
  0xe8   :  { %v171_v34 = vpop.f32.mrf.mxu0 }
  0xe9   :  { %v186_v35 = vmul.f32 %v182_v31, %v166_v26  ;;  %v183_v36 = vmul.f32 %v179_v32, %v168_v29  ;;  %v180_v37 = vmul.f32 0.044715, %v170_v33  ;;  %v172_v38 = vadd.f32 %v171_v34, %v42_v24 }
  0xea   :  { %v176_v1 = vmul.f32 0.5, %v170_v33 }
  0xeb   :  { %v190_v39 = vadd.f32 %v186_v35, %v166_v26  ;;  %v187_v40 = vmul.f32 %v183_v36, %v168_v29  ;;  %v184_v41 = vmul.f32 %v180_v37, %v170_v33  ;;  %v181_v42 = vmul.f32 0.044715, %v172_v38 }
  0xec   :  { %v177_v2 = vmul.f32 0.5, %v172_v38 }
  0xed   :  { %v194_v43 = vmul.f32 0.7978846, %v190_v39  ;;  %v191_v44 = vadd.f32 %v187_v40, %v168_v29  ;;  %v188_v45 = vmul.f32 %v184_v41, %v170_v33  ;;  %v185_v46 = vmul.f32 %v181_v42, %v172_v38 }
  0xef   :  { %275 = vtanh.f32 %v194_v43  ;;  %v195_v47 = vmul.f32 0.7978846, %v191_v44  ;;  %v192_v48 = vadd.f32 %v188_v45, %v170_v33  ;;  %v189_v49 = vmul.f32 %v185_v46, %v172_v38 }
  0xf1   :  { %277 = vtanh.f32 %v195_v47  ;;  %v196_v50 = vmul.f32 0.7978846, %v192_v48  ;;  %v193_v51 = vadd.f32 %v189_v49, %v172_v38 }
  0xf3   :  { %279 = vtanh.f32 %v196_v50  ;;  %v197_v52 = vmul.f32 0.7978846, %v193_v51 }
  0xf5   :  { %281 = vtanh.f32 %v197_v52 }
  0xfc   :  { %v276_v53 = vpop.eup %275 }
  0xfd   :  { %v202_v54 = vadd.f32 1.0, %v276_v53 }
  0xfe   :  { %v278_v55 = vpop.eup %277 }
  0xff   :  { %v203_v58 = vadd.f32 1.0, %v278_v55  ;;  %v206_v60 = vmul.f32 %v202_v54, %v174_v56 }
 0x100   :  { %v280_v59 = vpop.eup %279 }
 0x101   :  { %v207_v61 = vmul.f32 %v203_v58, %v175_v57  ;;  %v204_v62 = vadd.f32 1.0, %v280_v59 }
 0x102   :  { %v282_v63 = vpop.eup %281 }
 0x103   :  { %v247_v0 = vpack.c.bf16 %v207_v61, %v206_v60  ;;  %v205_v3 = vadd.f32 1.0, %v282_v63  ;;  %v208_v4 = vmul.f32 %v204_v62, %v176_v1 }
 0x105   :  { %222 = vst [vmem:[%s367_s3] sm:$0xff] %v247_v0  ;;  %v209_v5 = vmul.f32 %v205_v3, %v177_v2 }
 0x107   :  { %v248_v6 = vpack.c.bf16 %v209_v5, %v208_v4 }
 0x109   :  { %223 = vst [vmem:[%s367_s3 + $0x8] sm:$0xff] %v248_v6 }

// kernel: bert_with_additional_features.17
= control target key start
LH: loop header
LB: loop body
LE: loop exit
PB: predicated region body
PF: predicated region fallthrough
CT: control target
= control target key end

     0   :  { %s456_s1 = inlined_call_operand.vmem [shape: bf16[256,128], index: 1, kind: input, shape index: {}]   ;;  %s457_s0 = inlined_call_operand.vmem [shape: bf16[16,256], index: 0, kind: input, shape index: {}]   ;;  %s458_s3 = inlined_call_operand.vmem [shape: bf16[16,128], index: 3, kind: input, shape index: {}]   ;;  %s459_s2 = inlined_call_operand.vmem [shape: f32[1,128], index: 2, kind: input, shape index: {}]   ;;  %s460_s4 = inlined_call_operand.vmem [shape: f32[1,128], index: 4, kind: input, shape index: {}]   ;;  %s461_s5 = inlined_call_operand.vmem [shape: f32[1,128], index: 5, kind: input, shape index: {}]   ;;  %s462_s6 = inlined_call_operand.vmem [shape: bf16[16,128], index: 6, kind: output, shape index: {}]  }
   0x1   :  { %v329_v0 = vld [vmem:[%s456_s1 + $0x78] sm:$0xff]   ;;  %v331_v2 = vld [vmem:[%s456_s1 + $0x70] sm:$0xff]   ;;  %v333_v4 = vld [vmem:[%s456_s1 + $0x68] sm:$0xff]  }
   0x2   :  { %v330_v1 = vld [vmem:[%s456_s1 + $0x38] sm:$0xff]   ;;  %307 = vmatprep.subr.bf16.mxu0 %v329_v0  ;;  %v332_v3 = vld [vmem:[%s456_s1 + $0x30] sm:$0xff]   ;;  %v334_v5 = vld [vmem:[%s456_s1 + $0x28] sm:$0xff]  }
   0x3   :  { %308 = vmatpush3.bf16.msra.mxu0 %v330_v1  ;;  %v335_v6 = vld [vmem:[%s456_s1 + $0x60] sm:$0xff]   ;;  %v337_v8 = vld [vmem:[%s456_s1 + $0x58] sm:$0xff]   ;;  %v339_v10 = vld [vmem:[%s456_s1 + $0x50] sm:$0xff]  }
   0x4   :  { %309 = vmatprep.subr.bf16.mxu0 %v331_v2  ;;  %v336_v7 = vld [vmem:[%s456_s1 + $0x20] sm:$0xff]   ;;  %v338_v9 = vld [vmem:[%s456_s1 + $0x18] sm:$0xff]   ;;  %v340_v12 = vld [vmem:[%s456_s1 + $0x10] sm:$0xff]  }
   0x5   :  { %v347_v11 = vld [vmem:[%s457_s0 + $0x4] ss:$8 sps:$4 sm:$0xff]   ;;  %v345_v17 = vld [vmem:[%s457_s0] ss:$8 sps:$4 sm:$0xff]  }
   0x6   :  { %203 = vmatprep.mubr.bf16.mxu0 %v347_v11  ;;  %v341_v13 = vld [vmem:[%s456_s1 + $0x48] sm:$0xff]   ;;  %v343_v15 = vld [vmem:[%s456_s1 + $0x40] sm:$0xff]  }
   0x7   :  { %310 = vmatpush3.bf16.msra.mxu0 %v332_v3  ;;  %v342_v14 = vld [vmem:[%s456_s1 + $0x8] sm:$0xff]   ;;  %v344_v16 = vld [vmem:[%s456_s1] sm:$0xff]  }
   0x8   :  { %311 = vmatprep.subr.bf16.mxu0 %v333_v4  ;;  %v299_v19 = vld [vmem:[%s458_s3] sm:$0xff]  }
   0x9   :  { %v273_v20 = vld [vmem:[%s459_s2] ss:$0 sm:$0xff]  ;;  %v300_v23 = vunpack.c.l.bf16 %v299_v19  ;;  %v301_v29 = vunpack.c.h.bf16 %v299_v19 }
   0xa   :  { %v292_v48 = vld [vmem:[%s460_s4] ss:$0 sm:$0xff] }
   0xb   :  { %312 = vmatpush3.bf16.msra.mxu0 %v334_v5  ;;  %v293_v52 = vld [vmem:[%s461_s5] ss:$0 sm:$0xff] }
   0xc   :  { %313 = vmatprep.subr.bf16.mxu0 %v335_v6 }
   0xf   :  { %314 = vmatpush3.bf16.msra.mxu0 %v336_v7 }
  0x10   :  { %315 = vmatprep.subr.bf16.mxu0 %v337_v8 }
  0x13   :  { %316 = vmatpush3.bf16.msra.mxu0 %v338_v9 }
  0x14   :  { %317 = vmatprep.subr.bf16.mxu0 %v339_v10 }
  0x17   :  { %318 = vmatpush3.bf16.msra.mxu0 %v340_v12 }
  0x18   :  { %319 = vmatprep.subr.bf16.mxu0 %v341_v13 }
  0x1b   :  { %320 = vmatpush3.bf16.msra.mxu0 %v342_v14 }
  0x1c   :  { %321 = vmatprep.subr.bf16.mxu0 %v343_v15 }
  0x1f   :  { %322 = vmatpush3.bf16.msra.mxu0 %v344_v16 }
  0x22   :  { %204 = vmatmul.mubr.bf16.vlgmr.msra.gmra.mxu0 %v345_v17 }
  0xe2   :  { %v323_v18 = vpop.f32.mrf.mxu0 }
  0xe4   :  { %v324_v21 = vpop.f32.mrf.mxu0 }
  0xe5   :  { %v325_v22 = vadd.f32 %v324_v21, %v323_v18 }
  0xe6   :  { %v326_v24 = vpop.f32.mrf.mxu0 }
  0xe7   :  { %v206_v25 = vadd.f32 %v325_v22, %v273_v20 }
  0xe8   :  { %v327_v26 = vpop.f32.mrf.mxu0 }
  0xe9   :  { %v328_v27 = vadd.f32 %v327_v26, %v326_v24  ;;  %v216_v28 = vadd.f32 %v300_v23, %v206_v25 }
  0xeb   :  { %v209_v30 = vadd.f32 %v328_v27, %v273_v20  ;;  %218 = vadd.xlane.f32.xlu0 %v216_v28 }
  0xed   :  { %v217_v31 = vadd.f32 %v301_v29, %v209_v30 }
  0xef   :  { %220 = vadd.xlane.f32.xlu0 %v217_v31 }
 0x174   :  { %v219_v32 = vpop.xlane.xlu0 %218 }
 0x175   :  { %v223_v33 = vmul.f32 0.0078125, %v219_v32 }
 0x177   :  { %v225_v34 = vsub.f32 %v216_v28, %v223_v33 }
 0x178   :  { %v221_v35 = vpop.xlane.xlu0 %220 }
 0x179   :  { %v224_v36 = vmul.f32 0.0078125, %v221_v35  ;;  %v227_v37 = vmul.f32 %v225_v34, %v225_v34 }
 0x17b   :  { %v226_v38 = vsub.f32 %v217_v31, %v224_v36  ;;  %229 = vadd.xlane.f32.xlu1 %v227_v37 }
 0x17d   :  { %v228_v39 = vmul.f32 %v226_v38, %v226_v38 }
 0x17f   :  { %231 = vadd.xlane.f32.xlu1 %v228_v39 }
 0x204   :  { %v230_v40 = vpop.xlane.xlu1 %229 }
 0x205   :  { %v233_v41 = vmul.f32 0.0078125, %v230_v40 }
 0x207   :  { %v235_v42 = vadd.f32 1e-12, %v233_v41 }
 0x208   :  { %v232_v43 = vpop.xlane.xlu1 %231 }
 0x209   :  { %348 = vrsqrt.f32 %v235_v42  ;;  %v234_v44 = vmul.f32 0.0078125, %v232_v43 }
 0x20b   :  { %v236_v45 = vadd.f32 1e-12, %v234_v44 }
 0x20d   :  { %350 = vrsqrt.f32 %v236_v45 }
 0x216   :  { %v349_v46 = vpop.eup %348 }
 0x217   :  { %v239_v47 = vmul.f32 %v349_v46, %v225_v34 }
 0x219   :  { %v248_v50 = vmul.f32 %v292_v48, %v239_v47 }
 0x21a   :  { %v351_v49 = vpop.eup %350 }
 0x21b   :  { %v240_v51 = vmul.f32 %v351_v49, %v226_v38  ;;  %v257_v54 = vadd.f32 %v293_v52, %v248_v50 }
 0x21d   :  { %v249_v53 = vmul.f32 %v292_v48, %v240_v51 }
 0x21f   :  { %v258_v55 = vadd.f32 %v293_v52, %v249_v53 }
 0x221   :  { %v305_v56 = vpack.c.bf16 %v258_v55, %v257_v54 }
 0x223   :  { %306 = vst [vmem:[%s462_s6] sm:$0xff] %v305_v56  }

// kernel: bert_with_additional_features.23
= control target key start
LH: loop header
LB: loop body
LE: loop exit
PB: predicated region body
PF: predicated region fallthrough
CT: control target
= control target key end

     0   :  { %v450_v1 = vmov 0.0   ;;  %vm451_vm0 = vmmov 0   ;;  %vm162_vm1 = vcmask 1041408   ;;  %vm163_vm2 = vcmask 1042432   ;;  %s578_s0 = inlined_call_operand.vmem [shape: bf16[2,128], index: 0, kind: input, shape index: {}]   ;;  %s579_s1 = inlined_call_operand.vmem [shape: f32[2,5], index: 1, kind: input, shape index: {}]   ;;  %s580_s2 = inlined_call_operand.vmem [shape: bf16[128,128], index: 2, kind: input, shape index: {}]   ;;  %s581_s3 = inlined_call_operand.vmem [shape: f32[1,128], index: 3, kind: input, shape index: {}]   ;;  %s582_s4 = inlined_call_operand.vmem [shape: bf16[133,2], index: 4, kind: input, shape index: {}]   ;;  %s583_s5 = inlined_call_operand.vmem [shape: f32[1,2], index: 5, kind: input, shape index: {}]   ;;  %s584_s6 = inlined_call_operand.hbm [shape: f32[2,2], index: 6, kind: output, shape index: {}]  }
   0x1   :  { %v410_v0 = vld [vmem:[%s580_s2 + $0x38] sm:$0xff]   ;;  %360 = vmatprep.subr.bf16.mxu0 %v450_v1  ;;  %380 = vmatprep.subr.bf16.mxu1 %v450_v1  ;;  %v411_v2 = vld [vmem:[%s580_s2 + $0x30] sm:$0xff]   ;;  %v452_v3 = vmov 65535   ;;  %v412_v5 = vld [vmem:[%s580_s2 + $0x28] sm:$0xff]   ;;  %vm158_vm3 = vcmask 39936  }
   0x2   :  { %361 = vmatpush3.bf16.msra.mxu0 %v410_v0  ;;  %376 = vmatprep.mubr.msk.bf16.mxu0 %vm451_vm0, %v450_v1  ;;  %v164_v4 = vsel %vm162_vm1, 4294967295, %v452_v3  ;;  %v154_v7 = vld [vmem:[%s582_s4 + $0x40] sm:$0x7]  ;;  %v418_v12 = vld [vmem:[%s582_s4 + $0x38] sm:$0xff]   ;;  %v419_v14 = vld [vmem:[%s582_s4 + $0x30] sm:$0xff]  }
   0x3   :  { %362 = vmatprep.subr.bf16.mxu0 %v450_v1  ;;  %382 = vmatprep.mubr.msk.bf16.mxu1 %vm451_vm0, %v450_v1  ;;  %v165_v6 = vsel %vm163_vm2, %v164_v4, 0  ;;  %v156_v8 = vld [vmem:[%s579_s1] sm:$0x3]  ;;  %v414_v13 = vld [vmem:[%s580_s2 + $0x18] sm:$0xff]  }
   0x4   :  { %v167_v9 = vand.u32 %v165_v6, %v154_v7  ;;  %v413_v10 = vld [vmem:[%s580_s2 + $0x20] sm:$0xff]   ;;  %v157_v11 = vpack.c.bf16 %v156_v8, %v156_v8 }
   0x6   :  { %363 = vmatpush3.bf16.msra.mxu0 %v411_v2  ;;  %381 = vmatpush3.bf16.msra.mxu1 %v167_v9 }
   0x7   :  { %364 = vmatprep.subr.bf16.mxu0 %v450_v1  ;;  %386 = vmatprep.subr.bf16.mxu1 %v450_v1 }
   0x9   :  { %383 = vmatmul.mubr.msk.bf16.vlgmr.msra.gmra.mxu1 %vm158_vm3, %v157_v11 }
   0xa   :  { %365 = vmatpush3.bf16.msra.mxu0 %v412_v5  ;;  %387 = vmatpush3.bf16.msra.mxu1 %v418_v12 }
   0xb   :  { %366 = vmatprep.subr.bf16.mxu0 %v450_v1 }
   0xe   :  { %367 = vmatpush3.bf16.msra.mxu0 %v413_v10 }
   0xf   :  { %368 = vmatprep.subr.bf16.mxu0 %v450_v1 }
  0x10   :  { %11 = vsyncpa [#allocation3], 0  ;;  %388 = vmatprep.subr.bf16.mxu1 %v450_v1  ;;  %402 = vmatprep.mubr.msk.bf16.mxu1 %vm451_vm0, %v450_v1  ;;  %v415_v15 = vld [vmem:[%s580_s2 + $0x10] sm:$0xff]   ;;  %v420_v16 = vld [vmem:[%s582_s4 + $0x28] sm:$0xff]   ;;  %s453_s11 = smov [#allocation2]   ;;  %vm305_vm4 = vcmask 9216  }
  0x11   :  { %389 = vmatpush3.bf16.msra.mxu1 %v419_v14  ;;  %v416_v17 = vld [vmem:[%s580_s2 + $0x8] sm:$0xff]   ;;  %v417_v18 = vld [vmem:[%s580_s2] sm:$0xff]   ;;  %v422_v21 = vld [vmem:[%s582_s4 + $0x18] sm:$0xff]   ;;  %s313_s12 = sshll.u32 %s453_s11, 4  ;;  %s314_s12 = int_to_ptr.vmem [resolvable:$true] %s313_s12 }
  0x12   :  { %369 = vmatpush3.bf16.msra.mxu0 %v414_v13  ;;  %390 = vmatprep.subr.bf16.mxu1 %v450_v1  ;;  %v25_v19 = vld [vmem:[%s578_s0] sm:$0x1]  ;;  %v423_v22 = vld [vmem:[%s582_s4 + $0x10] sm:$0xff]   ;;  %v424_v23 = vld [vmem:[%s582_s4 + $0x8] sm:$0xff]   ;;  %p433_p1 = scmp.lt.s32.totalorder %s314_s12, %s314_s12 }
  0x13   :  { %370 = vmatprep.subr.bf16.mxu0 %v450_v1  ;;  %v421_v20 = vld [vmem:[%s582_s4 + $0x20] sm:$0xff]  }
  0x14   :  { %v425_v24 = vld [vmem:[%s582_s4] sm:$0xff]  }
  0x15   :  { %391 = vmatpush3.bf16.msra.mxu1 %v420_v16  ;;  %v321_v29 = vld [vmem:[%s581_s3] ss:$0 sm:$0xff]  ;;  %s428_s3 = scalar_lea.vmem %s314_s12, 32 }
  0x16   :  { %371 = vmatpush3.bf16.msra.mxu0 %v415_v15  ;;  %392 = vmatprep.subr.bf16.mxu1 %v450_v1  ;;  %v339_v38 = vld [vmem:[%s583_s5] ss:$0 sm:$0xff]  ;;  %p429_p0 = scmp.ne.s32.totalorder %s314_s12, %s428_s3  ;;  %p434_p2 = scmp.lt.s32.totalorder %s428_s3, %s428_s3 }
  0x17   :  { %372 = vmatprep.subr.bf16.mxu0 %v450_v1 }
  0x18   :  { %p435_p3 = por %p434_p2, %p433_p1 }
  0x19   :  { %393 = vmatpush3.bf16.msra.mxu1 %v421_v20 }
  0x1a   :  { %373 = vmatpush3.bf16.msra.mxu0 %v416_v17  ;;  %394 = vmatprep.subr.bf16.mxu1 %v450_v1  ;;  %p436_p4 = pnand %p435_p3, %p429_p0 }
  0x1b   :  { %374 = vmatprep.subr.bf16.mxu0 %v450_v1 }
  0x1d   :  { %395 = vmatpush3.bf16.msra.mxu1 %v422_v21 }
  0x1e   :  { %375 = vmatpush3.bf16.msra.mxu0 %v417_v18  ;;  %396 = vmatprep.subr.bf16.mxu1 %v450_v1 }
  0x21   :  { %377 = vmatmul.mubr.bf16.vlgmr.msra.gmra.mxu0 %v25_v19  ;;  %397 = vmatpush3.bf16.msra.mxu1 %v423_v22 }
  0x22   :  { %398 = vmatprep.subr.bf16.mxu1 %v450_v1 }
  0x25   :  { %399 = vmatpush3.bf16.msra.mxu1 %v424_v23 }
  0x26   :  { %400 = vmatprep.subr.bf16.mxu1 %v450_v1 }
  0x29   :  { %401 = vmatpush3.bf16.msra.mxu1 %v425_v24 }
  0xc9   :  { %v203_v25 = vpop.f32.mrf.mxu1 }
  0xcb   :  { %v384_v26 = vpop.f32.mrf.mxu1 }
  0xcd   :  { %v206_v27 = vpop.f32.mrf.mxu1 }
  0xcf   :  { %v385_v28 = vpop.f32.mrf.mxu1 }
  0xe1   :  { %v131_v30 = vpop.f32.mrf.mxu0 }
  0xe2   :  { %v132_v31 = vadd.f32 %v321_v29, %v131_v30 }
  0xe3   :  { %v378_v32 = vpop.f32.mrf.mxu0 }
  0xe4   :  { %426 = vtanh.f32 %v132_v31 }
  0xe5   :  { %v134_v33 = vpop.f32.mrf.mxu0 }
  0xe7   :  { %v379_v34 = vpop.f32.mrf.mxu0 }
  0xf1   :  { %v427_v35 = vpop.eup %426 }
  0xf2   :  { %v155_v36 = vpack.c.bf16 %v427_v35, %v427_v35 }
  0xf4   :  { %403 = vmatmul.mubr.bf16.vlgmr.msra.gmra.mxu1 %v155_v36 }
 0x1b4   :  { %v291_v37 = vpop.f32.mrf.mxu1 }
 0x1b5   :  { %v292_v39 = vadd.f32 %v291_v37, %v203_v25 }
 0x1b6   :  { %v404_v40 = vpop.f32.mrf.mxu1 }
 0x1b7   :  { %v304_v41 = vadd.f32 %v339_v38, %v292_v39 }
 0x1b8   :  { %v294_v42 = vpop.f32.mrf.mxu1 }
 0x1b9   :  { %306 = vst.msk [vmem:[#allocation2] sm:$0x3] %vm305_vm4, %v304_v41 }
 0x1ba   :  { %v405_v43 = vpop.f32.mrf.mxu1 }
 0x1bb   :  { %439 = shalt.err (!%p436_p4)
}
 0x1bc   :  { %316 = dma.vmem_to_hbm [thread:$0]  %s314_s12, 32, %s584_s6, [#allocation3]  }
 0x1bd   :  { %448 = dma.done.wait [#allocation3], 32  }
 0x1be   :  { %449 = vsyncadd [#allocation3], 4294967264 }
 0x1bf   :  { %320 = vsyncpa [#allocation3], 1 }

</bundles_post_ra>
